<compile_context>
chip_gen: v5e
topology: v5e:2x2
jax: 0.10.0
libtpu: 0.0.40
codegen_flags: <defaults>
</compile_context>

<pallas_src>
import functools
import math

import jax
import jax.numpy as jnp
from jax.experimental import pallas as pl
from jax.experimental.pallas import tpu as pltpu


# ----------------------------- Pallas kernels ------------------------------

def _attn_block_kernel(qx_ref, kx_ref, vx_ref, bias_ref,
                       wq_ref, bq_ref, wk_ref, bk_ref, wv_ref, bv_ref,
                       wo_ref, bo_ref, g_ref, beta_ref, o_ref,
                       *, heads, scale, eps):
    """Fused attention sub-layer for one batch element.

    Computes LayerNorm(x_q + OutProj(MHA(QProj(x_q), KProj(x_k), VProj(x_v))))."""
    xq = qx_ref[0]          # (Sq, E)  query input (= residual input)
    xk = kx_ref[0]          # (Sk, E)
    xv = vx_ref[0]          # (Sk, E)

    q = jnp.dot(xq, wq_ref[...], preferred_element_type=jnp.float32) + bq_ref[...]
    k = jnp.dot(xk, wk_ref[...], preferred_element_type=jnp.float32) + bk_ref[...]
    v = jnp.dot(xv, wv_ref[...], preferred_element_type=jnp.float32) + bv_ref[...]

    # Fold the 1/sqrt(embed) scale into Q (the mask bias is pre-scaled too, so
    # this is exactly equivalent to masked_fill followed by /sqrt(E)).
    q = q * jnp.float32(scale)
    bias = bias_ref[...]    # (Sq, Sk) additive mask bias (0 or -1e20*scale)

    E = q.shape[-1]
    D = E // heads
    ctx_parts = []
    for h in range(heads):                      # static unrolled head loop
        qh = q[:, h * D:(h + 1) * D]            # (Sq, D)
        kh = k[:, h * D:(h + 1) * D]            # (Sk, D)
        vh = v[:, h * D:(h + 1) * D]            # (Sk, D)
        # Contract last axes directly -> no explicit K transpose.
        e = jax.lax.dot_general(qh, kh, (((1,), (1,)), ((), ())),
                                preferred_element_type=jnp.float32)   # (Sq, Sk)
        e = e + bias
        m = jnp.max(e, axis=-1, keepdims=True)
        p = jnp.exp(e - m)
        denom = jnp.sum(p, axis=-1, keepdims=True)
        attn = p * pl.reciprocal(denom, approx=True)
        ctx_parts.append(jnp.dot(attn, vh, preferred_element_type=jnp.float32))
    ctx = jnp.concatenate(ctx_parts, axis=-1)   # (Sq, E), heads concatenated

    att = jnp.dot(ctx, wo_ref[...], preferred_element_type=jnp.float32) + bo_ref[...]

    # Residual + LayerNorm (over feature axis).
    z = xq + att
    mean = jnp.mean(z, axis=-1, keepdims=True)
    c = z - mean
    var = jnp.mean(c * c, axis=-1, keepdims=True)
    o_ref[0] = c * jax.lax.rsqrt(var + eps) * g_ref[...] + beta_ref[...]


def _ffn_block_kernel(x_ref, w1_ref, b1_ref, w2_ref, b2_ref, g_ref, bln_ref,
                      o_ref, *, eps):
    """Fused feed-forward sub-layer: LayerNorm(x + W2(relu(W1 x + b1)) + b2)."""
    x = x_ref[...]                              # (tm, E)
    h = jnp.dot(x, w1_ref[...], preferred_element_type=jnp.float32) + b1_ref[...]
    h = jnp.maximum(h, 0.0)
    y = jnp.dot(h, w2_ref[...], preferred_element_type=jnp.float32) + b2_ref[...]
    z = x + y
    mean = jnp.mean(z, axis=-1, keepdims=True)
    c = z - mean
    var = jnp.mean(c * c, axis=-1, keepdims=True)
    o_ref[...] = c * jax.lax.rsqrt(var + eps) * g_ref[...] + bln_ref[...]


# ------------------------------ wrappers ------------------------------------

def attention_sublayer(p, ln_g, ln_b, q_in, k_in, v_in, mask_bias, heads,
                       scale, eps=1e-5):
    """One fused pallas_call: attention(values=v_in, keys=k_in, queries=q_in)
    followed by residual-add with q_in and LayerNorm."""
    B, Sq, E = q_in.shape
    Sk = k_in.shape[1]

    kern = functools.partial(_attn_block_kernel, heads=heads, scale=scale,
                             eps=eps)
    act_spec_q = pl.BlockSpec((1, Sq, E), lambda b: (b, 0, 0))
    act_spec_k = pl.BlockSpec((1, Sk, E), lambda b: (b, 0, 0))
    mat_spec = pl.BlockSpec((E, E), lambda b: (0, 0))
    vec_spec = pl.BlockSpec((1, E), lambda b: (0, 0))

    return pl.pallas_call(
        kern,
        out_shape=jax.ShapeDtypeStruct((B, Sq, E), jnp.float32),
        grid=(B,),
        in_specs=[
            act_spec_q,                                  # query input / residual
            act_spec_k,                                  # key input
            act_spec_k,                                  # value input
            pl.BlockSpec((Sq, Sk), lambda b: (0, 0)),    # additive mask bias
            mat_spec, vec_spec,                          # wq, bq
            mat_spec, vec_spec,                          # wk, bk
            mat_spec, vec_spec,                          # wv, bv
            mat_spec, vec_spec,                          # wo, bo
            vec_spec, vec_spec,                          # ln gamma, ln beta
        ],
        out_specs=pl.BlockSpec((1, Sq, E), lambda b: (b, 0, 0)),
        compiler_params=pltpu.CompilerParams(
            dimension_semantics=("parallel",)),
    )(q_in, k_in, v_in, mask_bias,
      p["wq"], p["bq"].reshape(1, E),
      p["wk"], p["bk"].reshape(1, E),
      p["wv"], p["bv"].reshape(1, E),
      p["wo"], p["bo"].reshape(1, E),
      ln_g.reshape(1, E), ln_b.reshape(1, E))


def ffn_sublayer(params, x, eps=1e-5, tm=8):
    """One fused pallas_call: Linear -> ReLU -> Linear -> +x -> LayerNorm."""
    B, S, E = x.shape
    M = B * S
    Hf = params["ff_w1"].shape[1]
    tm = min(tm, M)
    assert M % tm == 0

    x2d = x.reshape(M, E)
    kern = functools.partial(_ffn_block_kernel, eps=eps)
    out = pl.pallas_call(
        kern,
        out_shape=jax.ShapeDtypeStruct((M, E), jnp.float32),
        grid=(M // tm,),
        in_specs=[
            pl.BlockSpec((tm, E), lambda i: (i, 0)),
            pl.BlockSpec((E, Hf), lambda i: (0, 0)),
            pl.BlockSpec((1, Hf), lambda i: (0, 0)),
            pl.BlockSpec((Hf, E), lambda i: (0, 0)),
            pl.BlockSpec((1, E), lambda i: (0, 0)),
            pl.BlockSpec((1, E), lambda i: (0, 0)),
            pl.BlockSpec((1, E), lambda i: (0, 0)),
        ],
        out_specs=pl.BlockSpec((tm, E), lambda i: (i, 0)),
        compiler_params=pltpu.CompilerParams(
            dimension_semantics=("parallel",)),
    )(x2d, params["ff_w1"], params["ff_b1"].reshape(1, Hf),
      params["ff_w2"], params["ff_b2"].reshape(1, E),
      params["ln3_g"].reshape(1, E), params["ln3_b"].reshape(1, E))
    return out.reshape(B, S, E)


@functools.partial(jax.jit, static_argnames=("heads",))
def decoder_block(params, values, keys, x, src_mask, trg_mask, heads):
    E = x.shape[-1]
    scale = 1.0 / math.sqrt(float(E))           # PyTorch uses sqrt(embed_size)

    # Pre-scaled additive mask biases (exactly matches masked_fill(-1e20)/sqrt(E)).
    trg_bias = (jnp.where(trg_mask == 0, jnp.float32(-1e20), jnp.float32(0.0))
                * jnp.float32(scale))
    src_bias = (jnp.where(src_mask == 0, jnp.float32(-1e20), jnp.float32(0.0))
                * jnp.float32(scale))

    # TODO(synk): nn.Dropout implemented as identity (eval-mode / p effectively 0).

    # Self-attention sub-layer: norm1(x + attention1(x, x, x, trg_mask))
    x1 = attention_sublayer(params["attn1"], params["ln1_g"], params["ln1_b"],
                            q_in=x, k_in=x, v_in=x, mask_bias=trg_bias,
                            heads=heads, scale=scale)

    # Cross-attention sub-layer: norm2(x1 + attention2(values, keys, x1, src_mask))
    x2 = attention_sublayer(params["attn2"], params["ln2_g"], params["ln2_b"],
                            q_in=x1, k_in=keys, v_in=values, mask_bias=src_bias,
                            heads=heads, scale=scale)

    # Feed-forward sub-layer: norm3(ff(x2) + x2)
    return ffn_sublayer(params, x2)


# --------------------------- parameter init ---------------------------------

def _lin_params(key, fan_in, fan_out):
    kw, kb = jax.random.split(key)
    w = jax.random.normal(kw, (fan_in, fan_out), jnp.float32) * 0.02
    b = jax.random.normal(kb, (fan_out,), jnp.float32) * 0.02
    return w, b


def _attn_params(key, E):
    ks = jax.random.split(key, 4)
    wv, bv = _lin_params(ks[0], E, E)
    wk, bk = _lin_params(ks[1], E, E)
    wq, bq = _lin_params(ks[2], E, E)
    wo, bo = _lin_params(ks[3], E, E)
    return dict(wv=wv, bv=bv, wk=wk, bk=bk, wq=wq, bq=bq, wo=wo, bo=bo)


def init_params(key, E, forward_expansion):
    ks = jax.random.split(key, 4)
    ff_w1, ff_b1 = _lin_params(ks[2], E, forward_expansion * E)
    ff_w2, ff_b2 = _lin_params(ks[3], forward_expansion * E, E)
    return dict(
        attn1=_attn_params(ks[0], E),
        attn2=_attn_params(ks[1], E),
        ln1_g=jnp.ones((E,), jnp.float32), ln1_b=jnp.zeros((E,), jnp.float32),
        ln2_g=jnp.ones((E,), jnp.float32), ln2_b=jnp.zeros((E,), jnp.float32),
        ln3_g=jnp.ones((E,), jnp.float32), ln3_b=jnp.zeros((E,), jnp.float32),
        ff_w1=ff_w1, ff_b1=ff_b1, ff_w2=ff_w2, ff_b2=ff_b2,
    )


# ------------------------------- main ----------------------------------------

if __name__ == "__main__":
    B, S, E, H, FE = 2, 8, 32, 4, 4   # batch, seq, embed, heads, forward_expansion

    key = jax.random.PRNGKey(0)
    kp, kv, kk, kx = jax.random.split(key, 4)
    params = init_params(kp, E, FE)

    values = jax.random.normal(kv, (B, S, E), jnp.float32)   # encoder values
    keys_in = jax.random.normal(kk, (B, S, E), jnp.float32)  # encoder keys
    x = jax.random.normal(kx, (B, S, E), jnp.float32)        # decoder input

    trg_mask = jnp.tril(jnp.ones((S, S), jnp.float32))       # causal mask (Sq, Sk)
    src_mask = jnp.ones((S, S), jnp.float32)                 # full visibility

    out = decoder_block(params, values, keys_in, x, src_mask, trg_mask, H)
    jax.block_until_ready(out)
    assert out.shape == (B, S, E)
    print("KERNEL_OK")
</pallas_src>

<mosaic_0001>
module attributes {stable_mosaic.version = 11 : i64} {
  func.func @_attn_block_kernel(%arg0: i32, %arg1: memref<1x8x32xf32, #tpu.memory_space<vmem>>, %arg2: memref<1x8x32xf32, #tpu.memory_space<vmem>>, %arg3: memref<1x8x32xf32, #tpu.memory_space<vmem>>, %arg4: memref<8x8xf32, #tpu.memory_space<vmem>>, %arg5: memref<32x32xf32, #tpu.memory_space<vmem>>, %arg6: memref<1x32xf32, #tpu.memory_space<vmem>>, %arg7: memref<32x32xf32, #tpu.memory_space<vmem>>, %arg8: memref<1x32xf32, #tpu.memory_space<vmem>>, %arg9: memref<32x32xf32, #tpu.memory_space<vmem>>, %arg10: memref<1x32xf32, #tpu.memory_space<vmem>>, %arg11: memref<32x32xf32, #tpu.memory_space<vmem>>, %arg12: memref<1x32xf32, #tpu.memory_space<vmem>>, %arg13: memref<1x32xf32, #tpu.memory_space<vmem>>, %arg14: memref<1x32xf32, #tpu.memory_space<vmem>>, %arg15: memref<1x8x32xf32, #tpu.memory_space<vmem>>) attributes {dimension_semantics = [#tpu.dimension_semantics<parallel>], iteration_bounds = array<i64: 2>, scalar_prefetch = 0 : i64, scratch_operands = 0 : i64, tpu.core_type = #tpu.core_type<tc>, window_params = [{transform_indices = @transform_0, window_bounds = array<i64: 1, 8, 32>}, {transform_indices = @transform_1, window_bounds = array<i64: 1, 8, 32>}, {transform_indices = @transform_2, window_bounds = array<i64: 1, 8, 32>}, {pipeline_mode = #tpu.pipeline_mode<synchronous>, transform_indices = @transform_3, window_bounds = array<i64: 8, 8>}, {pipeline_mode = #tpu.pipeline_mode<synchronous>, transform_indices = @transform_4, window_bounds = array<i64: 32, 32>}, {pipeline_mode = #tpu.pipeline_mode<synchronous>, transform_indices = @transform_5, window_bounds = array<i64: 1, 32>}, {pipeline_mode = #tpu.pipeline_mode<synchronous>, transform_indices = @transform_6, window_bounds = array<i64: 32, 32>}, {pipeline_mode = #tpu.pipeline_mode<synchronous>, transform_indices = @transform_7, window_bounds = array<i64: 1, 32>}, {pipeline_mode = #tpu.pipeline_mode<synchronous>, transform_indices = @transform_8, window_bounds = array<i64: 32, 32>}, {pipeline_mode = #tpu.pipeline_mode<synchronous>, transform_indices = @transform_9, window_bounds = array<i64: 1, 32>}, {pipeline_mode = #tpu.pipeline_mode<synchronous>, transform_indices = @transform_10, window_bounds = array<i64: 32, 32>}, {pipeline_mode = #tpu.pipeline_mode<synchronous>, transform_indices = @transform_11, window_bounds = array<i64: 1, 32>}, {pipeline_mode = #tpu.pipeline_mode<synchronous>, transform_indices = @transform_12, window_bounds = array<i64: 1, 32>}, {pipeline_mode = #tpu.pipeline_mode<synchronous>, transform_indices = @transform_13, window_bounds = array<i64: 1, 32>}, {transform_indices = @transform_14, window_bounds = array<i64: 1, 8, 32>}]} {
    %c0 = arith.constant 0 : index
    %c0_0 = arith.constant 0 : index
    %c0_1 = arith.constant 0 : index
    %0 = vector.load %arg1[%c0, %c0_0, %c0_1] : memref<1x8x32xf32, #tpu.memory_space<vmem>>, vector<1x8x32xf32>
    %1 = vector.shape_cast %0 : vector<1x8x32xf32> to vector<8x32xf32>
    %c0_2 = arith.constant 0 : index
    %c0_3 = arith.constant 0 : index
    %c0_4 = arith.constant 0 : index
    %2 = vector.load %arg2[%c0_2, %c0_3, %c0_4] : memref<1x8x32xf32, #tpu.memory_space<vmem>>, vector<1x8x32xf32>
    %3 = vector.shape_cast %2 : vector<1x8x32xf32> to vector<8x32xf32>
    %c0_5 = arith.constant 0 : index
    %c0_6 = arith.constant 0 : index
    %c0_7 = arith.constant 0 : index
    %4 = vector.load %arg3[%c0_5, %c0_6, %c0_7] : memref<1x8x32xf32, #tpu.memory_space<vmem>>, vector<1x8x32xf32>
    %5 = vector.shape_cast %4 : vector<1x8x32xf32> to vector<8x32xf32>
    %c0_8 = arith.constant 0 : index
    %c0_9 = arith.constant 0 : index
    %6 = vector.load %arg5[%c0_8, %c0_9] : memref<32x32xf32, #tpu.memory_space<vmem>>, vector<32x32xf32>
    %cst = arith.constant dense<0.000000e+00> : vector<8x32xf32>
    %7 = tpu.matmul %1, %6, %cst {dimension_numbers = #tpu.dot_dimension_numbers<[1], [0], [0], [1], [0, 0, 1, 1], [], []>} : vector<8x32xf32>, vector<32x32xf32>, vector<8x32xf32> -> vector<8x32xf32>
    %c0_10 = arith.constant 0 : index
    %c0_11 = arith.constant 0 : index
    %8 = vector.load %arg6[%c0_10, %c0_11] : memref<1x32xf32, #tpu.memory_space<vmem>>, vector<1x32xf32>
    %9 = vector.broadcast %8 : vector<1x32xf32> to vector<8x32xf32>
    %10 = arith.addf %7, %9 : vector<8x32xf32>
    %c0_12 = arith.constant 0 : index
    %c0_13 = arith.constant 0 : index
    %11 = vector.load %arg7[%c0_12, %c0_13] : memref<32x32xf32, #tpu.memory_space<vmem>>, vector<32x32xf32>
    %cst_14 = arith.constant dense<0.000000e+00> : vector<8x32xf32>
    %12 = tpu.matmul %3, %11, %cst_14 {dimension_numbers = #tpu.dot_dimension_numbers<[1], [0], [0], [1], [0, 0, 1, 1], [], []>} : vector<8x32xf32>, vector<32x32xf32>, vector<8x32xf32> -> vector<8x32xf32>
    %c0_15 = arith.constant 0 : index
    %c0_16 = arith.constant 0 : index
    %13 = vector.load %arg8[%c0_15, %c0_16] : memref<1x32xf32, #tpu.memory_space<vmem>>, vector<1x32xf32>
    %14 = vector.broadcast %13 : vector<1x32xf32> to vector<8x32xf32>
    %15 = arith.addf %12, %14 : vector<8x32xf32>
    %c0_17 = arith.constant 0 : index
    %c0_18 = arith.constant 0 : index
    %16 = vector.load %arg9[%c0_17, %c0_18] : memref<32x32xf32, #tpu.memory_space<vmem>>, vector<32x32xf32>
    %cst_19 = arith.constant dense<0.000000e+00> : vector<8x32xf32>
    %17 = tpu.matmul %5, %16, %cst_19 {dimension_numbers = #tpu.dot_dimension_numbers<[1], [0], [0], [1], [0, 0, 1, 1], [], []>} : vector<8x32xf32>, vector<32x32xf32>, vector<8x32xf32> -> vector<8x32xf32>
    %c0_20 = arith.constant 0 : index
    %c0_21 = arith.constant 0 : index
    %18 = vector.load %arg10[%c0_20, %c0_21] : memref<1x32xf32, #tpu.memory_space<vmem>>, vector<1x32xf32>
    %19 = vector.broadcast %18 : vector<1x32xf32> to vector<8x32xf32>
    %20 = arith.addf %17, %19 : vector<8x32xf32>
    %cst_22 = arith.constant 0.176776692 : f32
    %21 = vector.broadcast %cst_22 : f32 to vector<8x32xf32>
    %22 = arith.mulf %10, %21 : vector<8x32xf32>
    %c0_23 = arith.constant 0 : index
    %c0_24 = arith.constant 0 : index
    %23 = vector.load %arg4[%c0_23, %c0_24] : memref<8x8xf32, #tpu.memory_space<vmem>>, vector<8x8xf32>
    %24 = vector.extract_strided_slice %22 {offsets = [0, 0], sizes = [8, 8], strides = [1, 1]} : vector<8x32xf32> to vector<8x8xf32>
    %25 = vector.extract_strided_slice %15 {offsets = [0, 0], sizes = [8, 8], strides = [1, 1]} : vector<8x32xf32> to vector<8x8xf32>
    %26 = vector.extract_strided_slice %20 {offsets = [0, 0], sizes = [8, 8], strides = [1, 1]} : vector<8x32xf32> to vector<8x8xf32>
    %cst_25 = arith.constant dense<0.000000e+00> : vector<8x8xf32>
    %27 = tpu.matmul %24, %25, %cst_25 {dimension_numbers = #tpu.dot_dimension_numbers<[1], [1], [0], [0], [0, 0, 1, 0], [], []>} : vector<8x8xf32>, vector<8x8xf32>, vector<8x8xf32> -> vector<8x8xf32>
    %28 = arith.addf %27, %23 : vector<8x8xf32>
    %cst_26 = arith.constant dense<0xFF800000> : vector<8xf32>
    %29 = vector.multi_reduction <maximumf>, %28, %cst_26 [1] : vector<8x8xf32> to vector<8xf32>
    %30 = vector.shape_cast %29 : vector<8xf32> to vector<8x1xf32>
    %31 = vector.broadcast %30 : vector<8x1xf32> to vector<8x8xf32>
    %32 = arith.subf %28, %31 : vector<8x8xf32>
    %33 = math.exp %32 : vector<8x8xf32>
    %cst_27 = arith.constant dense<0.000000e+00> : vector<8xf32>
    %34 = vector.multi_reduction <add>, %33, %cst_27 [1] : vector<8x8xf32> to vector<8xf32>
    %35 = vector.shape_cast %34 : vector<8xf32> to vector<8x1xf32>
    %36 = tpu.reciprocal %35 {approx = true} : vector<8x1xf32> -> vector<8x1xf32>
    %37 = vector.broadcast %36 : vector<8x1xf32> to vector<8x8xf32>
    %38 = arith.mulf %33, %37 : vector<8x8xf32>
    %cst_28 = arith.constant dense<0.000000e+00> : vector<8x8xf32>
    %39 = tpu.matmul %38, %26, %cst_28 {dimension_numbers = #tpu.dot_dimension_numbers<[1], [0], [0], [1], [0, 0, 1, 1], [], []>} : vector<8x8xf32>, vector<8x8xf32>, vector<8x8xf32> -> vector<8x8xf32>
    %40 = vector.extract_strided_slice %22 {offsets = [0, 8], sizes = [8, 8], strides = [1, 1]} : vector<8x32xf32> to vector<8x8xf32>
    %41 = vector.extract_strided_slice %15 {offsets = [0, 8], sizes = [8, 8], strides = [1, 1]} : vector<8x32xf32> to vector<8x8xf32>
    %42 = vector.extract_strided_slice %20 {offsets = [0, 8], sizes = [8, 8], strides = [1, 1]} : vector<8x32xf32> to vector<8x8xf32>
    %cst_29 = arith.constant dense<0.000000e+00> : vector<8x8xf32>
    %43 = tpu.matmul %40, %41, %cst_29 {dimension_numbers = #tpu.dot_dimension_numbers<[1], [1], [0], [0], [0, 0, 1, 0], [], []>} : vector<8x8xf32>, vector<8x8xf32>, vector<8x8xf32> -> vector<8x8xf32>
    %44 = arith.addf %43, %23 : vector<8x8xf32>
    %cst_30 = arith.constant dense<0xFF800000> : vector<8xf32>
    %45 = vector.multi_reduction <maximumf>, %44, %cst_30 [1] : vector<8x8xf32> to vector<8xf32>
    %46 = vector.shape_cast %45 : vector<8xf32> to vector<8x1xf32>
    %47 = vector.broadcast %46 : vector<8x1xf32> to vector<8x8xf32>
    %48 = arith.subf %44, %47 : vector<8x8xf32>
    %49 = math.exp %48 : vector<8x8xf32>
    %cst_31 = arith.constant dense<0.000000e+00> : vector<8xf32>
    %50 = vector.multi_reduction <add>, %49, %cst_31 [1] : vector<8x8xf32> to vector<8xf32>
    %51 = vector.shape_cast %50 : vector<8xf32> to vector<8x1xf32>
    %52 = tpu.reciprocal %51 {approx = true} : vector<8x1xf32> -> vector<8x1xf32>
    %53 = vector.broadcast %52 : vector<8x1xf32> to vector<8x8xf32>
    %54 = arith.mulf %49, %53 : vector<8x8xf32>
    %cst_32 = arith.constant dense<0.000000e+00> : vector<8x8xf32>
    %55 = tpu.matmul %54, %42, %cst_32 {dimension_numbers = #tpu.dot_dimension_numbers<[1], [0], [0], [1], [0, 0, 1, 1], [], []>} : vector<8x8xf32>, vector<8x8xf32>, vector<8x8xf32> -> vector<8x8xf32>
    %56 = vector.extract_strided_slice %22 {offsets = [0, 16], sizes = [8, 8], strides = [1, 1]} : vector<8x32xf32> to vector<8x8xf32>
    %57 = vector.extract_strided_slice %15 {offsets = [0, 16], sizes = [8, 8], strides = [1, 1]} : vector<8x32xf32> to vector<8x8xf32>
    %58 = vector.extract_strided_slice %20 {offsets = [0, 16], sizes = [8, 8], strides = [1, 1]} : vector<8x32xf32> to vector<8x8xf32>
    %cst_33 = arith.constant dense<0.000000e+00> : vector<8x8xf32>
    %59 = tpu.matmul %56, %57, %cst_33 {dimension_numbers = #tpu.dot_dimension_numbers<[1], [1], [0], [0], [0, 0, 1, 0], [], []>} : vector<8x8xf32>, vector<8x8xf32>, vector<8x8xf32> -> vector<8x8xf32>
    %60 = arith.addf %59, %23 : vector<8x8xf32>
    %cst_34 = arith.constant dense<0xFF800000> : vector<8xf32>
    %61 = vector.multi_reduction <maximumf>, %60, %cst_34 [1] : vector<8x8xf32> to vector<8xf32>
    %62 = vector.shape_cast %61 : vector<8xf32> to vector<8x1xf32>
    %63 = vector.broadcast %62 : vector<8x1xf32> to vector<8x8xf32>
    %64 = arith.subf %60, %63 : vector<8x8xf32>
    %65 = math.exp %64 : vector<8x8xf32>
    %cst_35 = arith.constant dense<0.000000e+00> : vector<8xf32>
    %66 = vector.multi_reduction <add>, %65, %cst_35 [1] : vector<8x8xf32> to vector<8xf32>
    %67 = vector.shape_cast %66 : vector<8xf32> to vector<8x1xf32>
    %68 = tpu.reciprocal %67 {approx = true} : vector<8x1xf32> -> vector<8x1xf32>
    %69 = vector.broadcast %68 : vector<8x1xf32> to vector<8x8xf32>
    %70 = arith.mulf %65, %69 : vector<8x8xf32>
    %cst_36 = arith.constant dense<0.000000e+00> : vector<8x8xf32>
    %71 = tpu.matmul %70, %58, %cst_36 {dimension_numbers = #tpu.dot_dimension_numbers<[1], [0], [0], [1], [0, 0, 1, 1], [], []>} : vector<8x8xf32>, vector<8x8xf32>, vector<8x8xf32> -> vector<8x8xf32>
    %72 = vector.extract_strided_slice %22 {offsets = [0, 24], sizes = [8, 8], strides = [1, 1]} : vector<8x32xf32> to vector<8x8xf32>
    %73 = vector.extract_strided_slice %15 {offsets = [0, 24], sizes = [8, 8], strides = [1, 1]} : vector<8x32xf32> to vector<8x8xf32>
    %74 = vector.extract_strided_slice %20 {offsets = [0, 24], sizes = [8, 8], strides = [1, 1]} : vector<8x32xf32> to vector<8x8xf32>
    %cst_37 = arith.constant dense<0.000000e+00> : vector<8x8xf32>
    %75 = tpu.matmul %72, %73, %cst_37 {dimension_numbers = #tpu.dot_dimension_numbers<[1], [1], [0], [0], [0, 0, 1, 0], [], []>} : vector<8x8xf32>, vector<8x8xf32>, vector<8x8xf32> -> vector<8x8xf32>
    %76 = arith.addf %75, %23 : vector<8x8xf32>
    %cst_38 = arith.constant dense<0xFF800000> : vector<8xf32>
    %77 = vector.multi_reduction <maximumf>, %76, %cst_38 [1] : vector<8x8xf32> to vector<8xf32>
    %78 = vector.shape_cast %77 : vector<8xf32> to vector<8x1xf32>
    %79 = vector.broadcast %78 : vector<8x1xf32> to vector<8x8xf32>
    %80 = arith.subf %76, %79 : vector<8x8xf32>
    %81 = math.exp %80 : vector<8x8xf32>
    %cst_39 = arith.constant dense<0.000000e+00> : vector<8xf32>
    %82 = vector.multi_reduction <add>, %81, %cst_39 [1] : vector<8x8xf32> to vector<8xf32>
    %83 = vector.shape_cast %82 : vector<8xf32> to vector<8x1xf32>
    %84 = tpu.reciprocal %83 {approx = true} : vector<8x1xf32> -> vector<8x1xf32>
    %85 = vector.broadcast %84 : vector<8x1xf32> to vector<8x8xf32>
    %86 = arith.mulf %81, %85 : vector<8x8xf32>
    %cst_40 = arith.constant dense<0.000000e+00> : vector<8x8xf32>
    %87 = tpu.matmul %86, %74, %cst_40 {dimension_numbers = #tpu.dot_dimension_numbers<[1], [0], [0], [1], [0, 0, 1, 1], [], []>} : vector<8x8xf32>, vector<8x8xf32>, vector<8x8xf32> -> vector<8x8xf32>
    %88 = tpu.concatenate %39, %55, %71, %87 in 1 : vector<8x8xf32>, vector<8x8xf32>, vector<8x8xf32>, vector<8x8xf32> -> vector<8x32xf32>
    %c0_41 = arith.constant 0 : index
    %c0_42 = arith.constant 0 : index
    %89 = vector.load %arg11[%c0_41, %c0_42] : memref<32x32xf32, #tpu.memory_space<vmem>>, vector<32x32xf32>
    %cst_43 = arith.constant dense<0.000000e+00> : vector<8x32xf32>
    %90 = tpu.matmul %88, %89, %cst_43 {dimension_numbers = #tpu.dot_dimension_numbers<[1], [0], [0], [1], [0, 0, 1, 1], [], []>} : vector<8x32xf32>, vector<32x32xf32>, vector<8x32xf32> -> vector<8x32xf32>
    %c0_44 = arith.constant 0 : index
    %c0_45 = arith.constant 0 : index
    %91 = vector.load %arg12[%c0_44, %c0_45] : memref<1x32xf32, #tpu.memory_space<vmem>>, vector<1x32xf32>
    %92 = vector.broadcast %91 : vector<1x32xf32> to vector<8x32xf32>
    %93 = arith.addf %90, %92 : vector<8x32xf32>
    %94 = arith.addf %1, %93 : vector<8x32xf32>
    %cst_46 = arith.constant dense<0.000000e+00> : vector<8xf32>
    %95 = vector.multi_reduction <add>, %94, %cst_46 [1] : vector<8x32xf32> to vector<8xf32>
    %96 = vector.shape_cast %95 : vector<8xf32> to vector<8x1xf32>
    %cst_47 = arith.constant 3.200000e+01 : f32
    %97 = vector.broadcast %cst_47 : f32 to vector<8x1xf32>
    %98 = arith.divf %96, %97 : vector<8x1xf32>
    %99 = vector.broadcast %98 : vector<8x1xf32> to vector<8x32xf32>
    %100 = arith.subf %94, %99 : vector<8x32xf32>
    %101 = arith.mulf %100, %100 : vector<8x32xf32>
    %cst_48 = arith.constant dense<0.000000e+00> : vector<8xf32>
    %102 = vector.multi_reduction <add>, %101, %cst_48 [1] : vector<8x32xf32> to vector<8xf32>
    %103 = vector.shape_cast %102 : vector<8xf32> to vector<8x1xf32>
    %cst_49 = arith.constant 3.200000e+01 : f32
    %104 = vector.broadcast %cst_49 : f32 to vector<8x1xf32>
    %105 = arith.divf %103, %104 : vector<8x1xf32>
    %cst_50 = arith.constant 9.99999974E-6 : f32
    %106 = vector.broadcast %cst_50 : f32 to vector<8x1xf32>
    %107 = arith.addf %105, %106 : vector<8x1xf32>
    %108 = math.rsqrt %107 : vector<8x1xf32>
    %109 = vector.broadcast %108 : vector<8x1xf32> to vector<8x32xf32>
    %110 = arith.mulf %100, %109 : vector<8x32xf32>
    %c0_51 = arith.constant 0 : index
    %c0_52 = arith.constant 0 : index
    %111 = vector.load %arg13[%c0_51, %c0_52] : memref<1x32xf32, #tpu.memory_space<vmem>>, vector<1x32xf32>
    %112 = vector.broadcast %111 : vector<1x32xf32> to vector<8x32xf32>
    %113 = arith.mulf %110, %112 : vector<8x32xf32>
    %c0_53 = arith.constant 0 : index
    %c0_54 = arith.constant 0 : index
    %114 = vector.load %arg14[%c0_53, %c0_54] : memref<1x32xf32, #tpu.memory_space<vmem>>, vector<1x32xf32>
    %115 = vector.broadcast %114 : vector<1x32xf32> to vector<8x32xf32>
    %116 = arith.addf %113, %115 : vector<8x32xf32>
    %c0_55 = arith.constant 0 : index
    %c0_56 = arith.constant 0 : index
    %c0_57 = arith.constant 0 : index
    %117 = vector.load %arg15[%c0_55, %c0_56, %c0_57] : memref<1x8x32xf32, #tpu.memory_space<vmem>>, vector<1x8x32xf32>
    %118 = vector.shape_cast %117 : vector<1x8x32xf32> to vector<8x32xf32>
    %119 = vector.shape_cast %116 : vector<8x32xf32> to vector<1x8x32xf32>
    tpu.vector_store %arg15[%c0_55, %c0_56, %c0_57], %119 {strides = array<i32>} : memref<1x8x32xf32, #tpu.memory_space<vmem>>, vector<1x8x32xf32>,
    return
  }
  func.func @transform_0(%arg0: i32) -> (i32, i32, i32) {
    %c0_i32 = arith.constant 0 : i32
    %c0_i32_0 = arith.constant 0 : i32
    %c0_i32_1 = arith.constant 0 : i32
    return %arg0, %c0_i32, %c0_i32_0 : i32, i32, i32
  }
  func.func @transform_1(%arg0: i32) -> (i32, i32, i32) {
    %c0_i32 = arith.constant 0 : i32
    %c0_i32_0 = arith.constant 0 : i32
    %c0_i32_1 = arith.constant 0 : i32
    return %arg0, %c0_i32, %c0_i32_0 : i32, i32, i32
  }
  func.func @transform_2(%arg0: i32) -> (i32, i32, i32) {
    %c0_i32 = arith.constant 0 : i32
    %c0_i32_0 = arith.constant 0 : i32
    %c0_i32_1 = arith.constant 0 : i32
    return %arg0, %c0_i32, %c0_i32_0 : i32, i32, i32
  }
  func.func @transform_3(%arg0: i32) -> (i32, i32) {
    %c0_i32 = arith.constant 0 : i32
    %c0_i32_0 = arith.constant 0 : i32
    %c0_i32_1 = arith.constant 0 : i32
    return %c0_i32, %c0_i32_0 : i32, i32
  }
  func.func @transform_4(%arg0: i32) -> (i32, i32) {
    %c0_i32 = arith.constant 0 : i32
    %c0_i32_0 = arith.constant 0 : i32
    %c0_i32_1 = arith.constant 0 : i32
    return %c0_i32, %c0_i32_0 : i32, i32
  }
  func.func @transform_5(%arg0: i32) -> (i32, i32) {
    %c0_i32 = arith.constant 0 : i32
    %c0_i32_0 = arith.constant 0 : i32
    %c0_i32_1 = arith.constant 0 : i32
    return %c0_i32, %c0_i32_0 : i32, i32
  }
  func.func @transform_6(%arg0: i32) -> (i32, i32) {
    %c0_i32 = arith.constant 0 : i32
    %c0_i32_0 = arith.constant 0 : i32
    %c0_i32_1 = arith.constant 0 : i32
    return %c0_i32, %c0_i32_0 : i32, i32
  }
  func.func @transform_7(%arg0: i32) -> (i32, i32) {
    %c0_i32 = arith.constant 0 : i32
    %c0_i32_0 = arith.constant 0 : i32
    %c0_i32_1 = arith.constant 0 : i32
    return %c0_i32, %c0_i32_0 : i32, i32
  }
  func.func @transform_8(%arg0: i32) -> (i32, i32) {
    %c0_i32 = arith.constant 0 : i32
    %c0_i32_0 = arith.constant 0 : i32
    %c0_i32_1 = arith.constant 0 : i32
    return %c0_i32, %c0_i32_0 : i32, i32
  }
  func.func @transform_9(%arg0: i32) -> (i32, i32) {
    %c0_i32 = arith.constant 0 : i32
    %c0_i32_0 = arith.constant 0 : i32
    %c0_i32_1 = arith.constant 0 : i32
    return %c0_i32, %c0_i32_0 : i32, i32
  }
  func.func @transform_10(%arg0: i32) -> (i32, i32) {
    %c0_i32 = arith.constant 0 : i32
    %c0_i32_0 = arith.constant 0 : i32
    %c0_i32_1 = arith.constant 0 : i32
    return %c0_i32, %c0_i32_0 : i32, i32
  }
  func.func @transform_11(%arg0: i32) -> (i32, i32) {
    %c0_i32 = arith.constant 0 : i32
    %c0_i32_0 = arith.constant 0 : i32
    %c0_i32_1 = arith.constant 0 : i32
    return %c0_i32, %c0_i32_0 : i32, i32
  }
  func.func @transform_12(%arg0: i32) -> (i32, i32) {
    %c0_i32 = arith.constant 0 : i32
    %c0_i32_0 = arith.constant 0 : i32
    %c0_i32_1 = arith.constant 0 : i32
    return %c0_i32, %c0_i32_0 : i32, i32
  }
  func.func @transform_13(%arg0: i32) -> (i32, i32) {
    %c0_i32 = arith.constant 0 : i32
    %c0_i32_0 = arith.constant 0 : i32
    %c0_i32_1 = arith.constant 0 : i32
    return %c0_i32, %c0_i32_0 : i32, i32
  }
  func.func @transform_14(%arg0: i32) -> (i32, i32, i32) {
    %c0_i32 = arith.constant 0 : i32
    %c0_i32_0 = arith.constant 0 : i32
    %c0_i32_1 = arith.constant 0 : i32
    return %arg0, %c0_i32, %c0_i32_0 : i32, i32, i32
  }
}

module attributes {stable_mosaic.version = 11 : i64} {
  func.func @_attn_block_kernel(%arg0: i32, %arg1: memref<1x8x32xf32, #tpu.memory_space<vmem>>, %arg2: memref<1x8x32xf32, #tpu.memory_space<vmem>>, %arg3: memref<1x8x32xf32, #tpu.memory_space<vmem>>, %arg4: memref<8x8xf32, #tpu.memory_space<vmem>>, %arg5: memref<32x32xf32, #tpu.memory_space<vmem>>, %arg6: memref<1x32xf32, #tpu.memory_space<vmem>>, %arg7: memref<32x32xf32, #tpu.memory_space<vmem>>, %arg8: memref<1x32xf32, #tpu.memory_space<vmem>>, %arg9: memref<32x32xf32, #tpu.memory_space<vmem>>, %arg10: memref<1x32xf32, #tpu.memory_space<vmem>>, %arg11: memref<32x32xf32, #tpu.memory_space<vmem>>, %arg12: memref<1x32xf32, #tpu.memory_space<vmem>>, %arg13: memref<1x32xf32, #tpu.memory_space<vmem>>, %arg14: memref<1x32xf32, #tpu.memory_space<vmem>>, %arg15: memref<1x8x32xf32, #tpu.memory_space<vmem>>) attributes {dimension_semantics = [#tpu.dimension_semantics<parallel>], iteration_bounds = array<i64: 2>, scalar_prefetch = 0 : i64, scratch_operands = 0 : i64, tpu.core_type = #tpu.core_type<tc>, window_params = [{transform_indices = @transform_0, window_bounds = array<i64: 1, 8, 32>}, {transform_indices = @transform_1, window_bounds = array<i64: 1, 8, 32>}, {transform_indices = @transform_2, window_bounds = array<i64: 1, 8, 32>}, {pipeline_mode = #tpu.pipeline_mode<synchronous>, transform_indices = @transform_3, window_bounds = array<i64: 8, 8>}, {pipeline_mode = #tpu.pipeline_mode<synchronous>, transform_indices = @transform_4, window_bounds = array<i64: 32, 32>}, {pipeline_mode = #tpu.pipeline_mode<synchronous>, transform_indices = @transform_5, window_bounds = array<i64: 1, 32>}, {pipeline_mode = #tpu.pipeline_mode<synchronous>, transform_indices = @transform_6, window_bounds = array<i64: 32, 32>}, {pipeline_mode = #tpu.pipeline_mode<synchronous>, transform_indices = @transform_7, window_bounds = array<i64: 1, 32>}, {pipeline_mode = #tpu.pipeline_mode<synchronous>, transform_indices = @transform_8, window_bounds = array<i64: 32, 32>}, {pipeline_mode = #tpu.pipeline_mode<synchronous>, transform_indices = @transform_9, window_bounds = array<i64: 1, 32>}, {pipeline_mode = #tpu.pipeline_mode<synchronous>, transform_indices = @transform_10, window_bounds = array<i64: 32, 32>}, {pipeline_mode = #tpu.pipeline_mode<synchronous>, transform_indices = @transform_11, window_bounds = array<i64: 1, 32>}, {pipeline_mode = #tpu.pipeline_mode<synchronous>, transform_indices = @transform_12, window_bounds = array<i64: 1, 32>}, {pipeline_mode = #tpu.pipeline_mode<synchronous>, transform_indices = @transform_13, window_bounds = array<i64: 1, 32>}, {transform_indices = @transform_14, window_bounds = array<i64: 1, 8, 32>}]} {
    %c0 = arith.constant 0 : index
    %c0_0 = arith.constant 0 : index
    %c0_1 = arith.constant 0 : index
    %0 = vector.load %arg1[%c0, %c0_0, %c0_1] : memref<1x8x32xf32, #tpu.memory_space<vmem>>, vector<1x8x32xf32>
    %1 = vector.shape_cast %0 : vector<1x8x32xf32> to vector<8x32xf32>
    %c0_2 = arith.constant 0 : index
    %c0_3 = arith.constant 0 : index
    %c0_4 = arith.constant 0 : index
    %2 = vector.load %arg2[%c0_2, %c0_3, %c0_4] : memref<1x8x32xf32, #tpu.memory_space<vmem>>, vector<1x8x32xf32>
    %3 = vector.shape_cast %2 : vector<1x8x32xf32> to vector<8x32xf32>
    %c0_5 = arith.constant 0 : index
    %c0_6 = arith.constant 0 : index
    %c0_7 = arith.constant 0 : index
    %4 = vector.load %arg3[%c0_5, %c0_6, %c0_7] : memref<1x8x32xf32, #tpu.memory_space<vmem>>, vector<1x8x32xf32>
    %5 = vector.shape_cast %4 : vector<1x8x32xf32> to vector<8x32xf32>
    %c0_8 = arith.constant 0 : index
    %c0_9 = arith.constant 0 : index
    %6 = vector.load %arg5[%c0_8, %c0_9] : memref<32x32xf32, #tpu.memory_space<vmem>>, vector<32x32xf32>
    %cst = arith.constant dense<0.000000e+00> : vector<8x32xf32>
    %7 = tpu.matmul %1, %6, %cst {dimension_numbers = #tpu.dot_dimension_numbers<[1], [0], [0], [1], [0, 0, 1, 1], [], []>} : vector<8x32xf32>, vector<32x32xf32>, vector<8x32xf32> -> vector<8x32xf32>
    %c0_10 = arith.constant 0 : index
    %c0_11 = arith.constant 0 : index
    %8 = vector.load %arg6[%c0_10, %c0_11] : memref<1x32xf32, #tpu.memory_space<vmem>>, vector<1x32xf32>
    %9 = vector.broadcast %8 : vector<1x32xf32> to vector<8x32xf32>
    %10 = arith.addf %7, %9 : vector<8x32xf32>
    %c0_12 = arith.constant 0 : index
    %c0_13 = arith.constant 0 : index
    %11 = vector.load %arg7[%c0_12, %c0_13] : memref<32x32xf32, #tpu.memory_space<vmem>>, vector<32x32xf32>
    %cst_14 = arith.constant dense<0.000000e+00> : vector<8x32xf32>
    %12 = tpu.matmul %3, %11, %cst_14 {dimension_numbers = #tpu.dot_dimension_numbers<[1], [0], [0], [1], [0, 0, 1, 1], [], []>} : vector<8x32xf32>, vector<32x32xf32>, vector<8x32xf32> -> vector<8x32xf32>
    %c0_15 = arith.constant 0 : index
    %c0_16 = arith.constant 0 : index
    %13 = vector.load %arg8[%c0_15, %c0_16] : memref<1x32xf32, #tpu.memory_space<vmem>>, vector<1x32xf32>
    %14 = vector.broadcast %13 : vector<1x32xf32> to vector<8x32xf32>
    %15 = arith.addf %12, %14 : vector<8x32xf32>
    %c0_17 = arith.constant 0 : index
    %c0_18 = arith.constant 0 : index
    %16 = vector.load %arg9[%c0_17, %c0_18] : memref<32x32xf32, #tpu.memory_space<vmem>>, vector<32x32xf32>
    %cst_19 = arith.constant dense<0.000000e+00> : vector<8x32xf32>
    %17 = tpu.matmul %5, %16, %cst_19 {dimension_numbers = #tpu.dot_dimension_numbers<[1], [0], [0], [1], [0, 0, 1, 1], [], []>} : vector<8x32xf32>, vector<32x32xf32>, vector<8x32xf32> -> vector<8x32xf32>
    %c0_20 = arith.constant 0 : index
    %c0_21 = arith.constant 0 : index
    %18 = vector.load %arg10[%c0_20, %c0_21] : memref<1x32xf32, #tpu.memory_space<vmem>>, vector<1x32xf32>
    %19 = vector.broadcast %18 : vector<1x32xf32> to vector<8x32xf32>
    %20 = arith.addf %17, %19 : vector<8x32xf32>
    %cst_22 = arith.constant 0.176776692 : f32
    %21 = vector.broadcast %cst_22 : f32 to vector<8x32xf32>
    %22 = arith.mulf %10, %21 : vector<8x32xf32>
    %c0_23 = arith.constant 0 : index
    %c0_24 = arith.constant 0 : index
    %23 = vector.load %arg4[%c0_23, %c0_24] : memref<8x8xf32, #tpu.memory_space<vmem>>, vector<8x8xf32>
    %24 = vector.extract_strided_slice %22 {offsets = [0, 0], sizes = [8, 8], strides = [1, 1]} : vector<8x32xf32> to vector<8x8xf32>
    %25 = vector.extract_strided_slice %15 {offsets = [0, 0], sizes = [8, 8], strides = [1, 1]} : vector<8x32xf32> to vector<8x8xf32>
    %26 = vector.extract_strided_slice %20 {offsets = [0, 0], sizes = [8, 8], strides = [1, 1]} : vector<8x32xf32> to vector<8x8xf32>
    %cst_25 = arith.constant dense<0.000000e+00> : vector<8x8xf32>
    %27 = tpu.matmul %24, %25, %cst_25 {dimension_numbers = #tpu.dot_dimension_numbers<[1], [1], [0], [0], [0, 0, 1, 0], [], []>} : vector<8x8xf32>, vector<8x8xf32>, vector<8x8xf32> -> vector<8x8xf32>
    %28 = arith.addf %27, %23 : vector<8x8xf32>
    %cst_26 = arith.constant dense<0xFF800000> : vector<8xf32>
    %29 = vector.multi_reduction <maximumf>, %28, %cst_26 [1] : vector<8x8xf32> to vector<8xf32>
    %30 = vector.shape_cast %29 : vector<8xf32> to vector<8x1xf32>
    %31 = vector.broadcast %30 : vector<8x1xf32> to vector<8x8xf32>
    %32 = arith.subf %28, %31 : vector<8x8xf32>
    %33 = math.exp %32 : vector<8x8xf32>
    %cst_27 = arith.constant dense<0.000000e+00> : vector<8xf32>
    %34 = vector.multi_reduction <add>, %33, %cst_27 [1] : vector<8x8xf32> to vector<8xf32>
    %35 = vector.shape_cast %34 : vector<8xf32> to vector<8x1xf32>
    %36 = tpu.reciprocal %35 {approx = true} : vector<8x1xf32> -> vector<8x1xf32>
    %37 = vector.broadcast %36 : vector<8x1xf32> to vector<8x8xf32>
    %38 = arith.mulf %33, %37 : vector<8x8xf32>
    %cst_28 = arith.constant dense<0.000000e+00> : vector<8x8xf32>
    %39 = tpu.matmul %38, %26, %cst_28 {dimension_numbers = #tpu.dot_dimension_numbers<[1], [0], [0], [1], [0, 0, 1, 1], [], []>} : vector<8x8xf32>, vector<8x8xf32>, vector<8x8xf32> -> vector<8x8xf32>
    %40 = vector.extract_strided_slice %22 {offsets = [0, 8], sizes = [8, 8], strides = [1, 1]} : vector<8x32xf32> to vector<8x8xf32>
    %41 = vector.extract_strided_slice %15 {offsets = [0, 8], sizes = [8, 8], strides = [1, 1]} : vector<8x32xf32> to vector<8x8xf32>
    %42 = vector.extract_strided_slice %20 {offsets = [0, 8], sizes = [8, 8], strides = [1, 1]} : vector<8x32xf32> to vector<8x8xf32>
    %cst_29 = arith.constant dense<0.000000e+00> : vector<8x8xf32>
    %43 = tpu.matmul %40, %41, %cst_29 {dimension_numbers = #tpu.dot_dimension_numbers<[1], [1], [0], [0], [0, 0, 1, 0], [], []>} : vector<8x8xf32>, vector<8x8xf32>, vector<8x8xf32> -> vector<8x8xf32>
    %44 = arith.addf %43, %23 : vector<8x8xf32>
    %cst_30 = arith.constant dense<0xFF800000> : vector<8xf32>
    %45 = vector.multi_reduction <maximumf>, %44, %cst_30 [1] : vector<8x8xf32> to vector<8xf32>
    %46 = vector.shape_cast %45 : vector<8xf32> to vector<8x1xf32>
    %47 = vector.broadcast %46 : vector<8x1xf32> to vector<8x8xf32>
    %48 = arith.subf %44, %47 : vector<8x8xf32>
    %49 = math.exp %48 : vector<8x8xf32>
    %cst_31 = arith.constant dense<0.000000e+00> : vector<8xf32>
    %50 = vector.multi_reduction <add>, %49, %cst_31 [1] : vector<8x8xf32> to vector<8xf32>
    %51 = vector.shape_cast %50 : vector<8xf32> to vector<8x1xf32>
    %52 = tpu.reciprocal %51 {approx = true} : vector<8x1xf32> -> vector<8x1xf32>
    %53 = vector.broadcast %52 : vector<8x1xf32> to vector<8x8xf32>
    %54 = arith.mulf %49, %53 : vector<8x8xf32>
    %cst_32 = arith.constant dense<0.000000e+00> : vector<8x8xf32>
    %55 = tpu.matmul %54, %42, %cst_32 {dimension_numbers = #tpu.dot_dimension_numbers<[1], [0], [0], [1], [0, 0, 1, 1], [], []>} : vector<8x8xf32>, vector<8x8xf32>, vector<8x8xf32> -> vector<8x8xf32>
    %56 = vector.extract_strided_slice %22 {offsets = [0, 16], sizes = [8, 8], strides = [1, 1]} : vector<8x32xf32> to vector<8x8xf32>
    %57 = vector.extract_strided_slice %15 {offsets = [0, 16], sizes = [8, 8], strides = [1, 1]} : vector<8x32xf32> to vector<8x8xf32>
    %58 = vector.extract_strided_slice %20 {offsets = [0, 16], sizes = [8, 8], strides = [1, 1]} : vector<8x32xf32> to vector<8x8xf32>
    %cst_33 = arith.constant dense<0.000000e+00> : vector<8x8xf32>
    %59 = tpu.matmul %56, %57, %cst_33 {dimension_numbers = #tpu.dot_dimension_numbers<[1], [1], [0], [0], [0, 0, 1, 0], [], []>} : vector<8x8xf32>, vector<8x8xf32>, vector<8x8xf32> -> vector<8x8xf32>
    %60 = arith.addf %59, %23 : vector<8x8xf32>
    %cst_34 = arith.constant dense<0xFF800000> : vector<8xf32>
    %61 = vector.multi_reduction <maximumf>, %60, %cst_34 [1] : vector<8x8xf32> to vector<8xf32>
    %62 = vector.shape_cast %61 : vector<8xf32> to vector<8x1xf32>
    %63 = vector.broadcast %62 : vector<8x1xf32> to vector<8x8xf32>
    %64 = arith.subf %60, %63 : vector<8x8xf32>
    %65 = math.exp %64 : vector<8x8xf32>
    %cst_35 = arith.constant dense<0.000000e+00> : vector<8xf32>
    %66 = vector.multi_reduction <add>, %65, %cst_35 [1] : vector<8x8xf32> to vector<8xf32>
    %67 = vector.shape_cast %66 : vector<8xf32> to vector<8x1xf32>
    %68 = tpu.reciprocal %67 {approx = true} : vector<8x1xf32> -> vector<8x1xf32>
    %69 = vector.broadcast %68 : vector<8x1xf32> to vector<8x8xf32>
    %70 = arith.mulf %65, %69 : vector<8x8xf32>
    %cst_36 = arith.constant dense<0.000000e+00> : vector<8x8xf32>
    %71 = tpu.matmul %70, %58, %cst_36 {dimension_numbers = #tpu.dot_dimension_numbers<[1], [0], [0], [1], [0, 0, 1, 1], [], []>} : vector<8x8xf32>, vector<8x8xf32>, vector<8x8xf32> -> vector<8x8xf32>
    %72 = vector.extract_strided_slice %22 {offsets = [0, 24], sizes = [8, 8], strides = [1, 1]} : vector<8x32xf32> to vector<8x8xf32>
    %73 = vector.extract_strided_slice %15 {offsets = [0, 24], sizes = [8, 8], strides = [1, 1]} : vector<8x32xf32> to vector<8x8xf32>
    %74 = vector.extract_strided_slice %20 {offsets = [0, 24], sizes = [8, 8], strides = [1, 1]} : vector<8x32xf32> to vector<8x8xf32>
    %cst_37 = arith.constant dense<0.000000e+00> : vector<8x8xf32>
    %75 = tpu.matmul %72, %73, %cst_37 {dimension_numbers = #tpu.dot_dimension_numbers<[1], [1], [0], [0], [0, 0, 1, 0], [], []>} : vector<8x8xf32>, vector<8x8xf32>, vector<8x8xf32> -> vector<8x8xf32>
    %76 = arith.addf %75, %23 : vector<8x8xf32>
    %cst_38 = arith.constant dense<0xFF800000> : vector<8xf32>
    %77 = vector.multi_reduction <maximumf>, %76, %cst_38 [1] : vector<8x8xf32> to vector<8xf32>
    %78 = vector.shape_cast %77 : vector<8xf32> to vector<8x1xf32>
    %79 = vector.broadcast %78 : vector<8x1xf32> to vector<8x8xf32>
    %80 = arith.subf %76, %79 : vector<8x8xf32>
    %81 = math.exp %80 : vector<8x8xf32>
    %cst_39 = arith.constant dense<0.000000e+00> : vector<8xf32>
    %82 = vector.multi_reduction <add>, %81, %cst_39 [1] : vector<8x8xf32> to vector<8xf32>
    %83 = vector.shape_cast %82 : vector<8xf32> to vector<8x1xf32>
    %84 = tpu.reciprocal %83 {approx = true} : vector<8x1xf32> -> vector<8x1xf32>
    %85 = vector.broadcast %84 : vector<8x1xf32> to vector<8x8xf32>
    %86 = arith.mulf %81, %85 : vector<8x8xf32>
    %cst_40 = arith.constant dense<0.000000e+00> : vector<8x8xf32>
    %87 = tpu.matmul %86, %74, %cst_40 {dimension_numbers = #tpu.dot_dimension_numbers<[1], [0], [0], [1], [0, 0, 1, 1], [], []>} : vector<8x8xf32>, vector<8x8xf32>, vector<8x8xf32> -> vector<8x8xf32>
    %88 = tpu.concatenate %39, %55, %71, %87 in 1 : vector<8x8xf32>, vector<8x8xf32>, vector<8x8xf32>, vector<8x8xf32> -> vector<8x32xf32>
    %c0_41 = arith.constant 0 : index
    %c0_42 = arith.constant 0 : index
    %89 = vector.load %arg11[%c0_41, %c0_42] : memref<32x32xf32, #tpu.memory_space<vmem>>, vector<32x32xf32>
    %cst_43 = arith.constant dense<0.000000e+00> : vector<8x32xf32>
    %90 = tpu.matmul %88, %89, %cst_43 {dimension_numbers = #tpu.dot_dimension_numbers<[1], [0], [0], [1], [0, 0, 1, 1], [], []>} : vector<8x32xf32>, vector<32x32xf32>, vector<8x32xf32> -> vector<8x32xf32>
    %c0_44 = arith.constant 0 : index
    %c0_45 = arith.constant 0 : index
    %91 = vector.load %arg12[%c0_44, %c0_45] : memref<1x32xf32, #tpu.memory_space<vmem>>, vector<1x32xf32>
    %92 = vector.broadcast %91 : vector<1x32xf32> to vector<8x32xf32>
    %93 = arith.addf %90, %92 : vector<8x32xf32>
    %94 = arith.addf %1, %93 : vector<8x32xf32>
    %cst_46 = arith.constant dense<0.000000e+00> : vector<8xf32>
    %95 = vector.multi_reduction <add>, %94, %cst_46 [1] : vector<8x32xf32> to vector<8xf32>
    %96 = vector.shape_cast %95 : vector<8xf32> to vector<8x1xf32>
    %cst_47 = arith.constant 3.200000e+01 : f32
    %97 = vector.broadcast %cst_47 : f32 to vector<8x1xf32>
    %98 = arith.divf %96, %97 : vector<8x1xf32>
    %99 = vector.broadcast %98 : vector<8x1xf32> to vector<8x32xf32>
    %100 = arith.subf %94, %99 : vector<8x32xf32>
    %101 = arith.mulf %100, %100 : vector<8x32xf32>
    %cst_48 = arith.constant dense<0.000000e+00> : vector<8xf32>
    %102 = vector.multi_reduction <add>, %101, %cst_48 [1] : vector<8x32xf32> to vector<8xf32>
    %103 = vector.shape_cast %102 : vector<8xf32> to vector<8x1xf32>
    %cst_49 = arith.constant 3.200000e+01 : f32
    %104 = vector.broadcast %cst_49 : f32 to vector<8x1xf32>
    %105 = arith.divf %103, %104 : vector<8x1xf32>
    %cst_50 = arith.constant 9.99999974E-6 : f32
    %106 = vector.broadcast %cst_50 : f32 to vector<8x1xf32>
    %107 = arith.addf %105, %106 : vector<8x1xf32>
    %108 = math.rsqrt %107 : vector<8x1xf32>
    %109 = vector.broadcast %108 : vector<8x1xf32> to vector<8x32xf32>
    %110 = arith.mulf %100, %109 : vector<8x32xf32>
    %c0_51 = arith.constant 0 : index
    %c0_52 = arith.constant 0 : index
    %111 = vector.load %arg13[%c0_51, %c0_52] : memref<1x32xf32, #tpu.memory_space<vmem>>, vector<1x32xf32>
    %112 = vector.broadcast %111 : vector<1x32xf32> to vector<8x32xf32>
    %113 = arith.mulf %110, %112 : vector<8x32xf32>
    %c0_53 = arith.constant 0 : index
    %c0_54 = arith.constant 0 : index
    %114 = vector.load %arg14[%c0_53, %c0_54] : memref<1x32xf32, #tpu.memory_space<vmem>>, vector<1x32xf32>
    %115 = vector.broadcast %114 : vector<1x32xf32> to vector<8x32xf32>
    %116 = arith.addf %113, %115 : vector<8x32xf32>
    %c0_55 = arith.constant 0 : index
    %c0_56 = arith.constant 0 : index
    %c0_57 = arith.constant 0 : index
    %117 = vector.load %arg15[%c0_55, %c0_56, %c0_57] : memref<1x8x32xf32, #tpu.memory_space<vmem>>, vector<1x8x32xf32>
    %118 = vector.shape_cast %117 : vector<1x8x32xf32> to vector<8x32xf32>
    %119 = vector.shape_cast %116 : vector<8x32xf32> to vector<1x8x32xf32>
    tpu.vector_store %arg15[%c0_55, %c0_56, %c0_57], %119 {strides = array<i32>} : memref<1x8x32xf32, #tpu.memory_space<vmem>>, vector<1x8x32xf32>,
    return
  }
  func.func @transform_0(%arg0: i32) -> (i32, i32, i32) {
    %c0_i32 = arith.constant 0 : i32
    %c0_i32_0 = arith.constant 0 : i32
    %c0_i32_1 = arith.constant 0 : i32
    return %arg0, %c0_i32, %c0_i32_0 : i32, i32, i32
  }
  func.func @transform_1(%arg0: i32) -> (i32, i32, i32) {
    %c0_i32 = arith.constant 0 : i32
    %c0_i32_0 = arith.constant 0 : i32
    %c0_i32_1 = arith.constant 0 : i32
    return %arg0, %c0_i32, %c0_i32_0 : i32, i32, i32
  }
  func.func @transform_2(%arg0: i32) -> (i32, i32, i32) {
    %c0_i32 = arith.constant 0 : i32
    %c0_i32_0 = arith.constant 0 : i32
    %c0_i32_1 = arith.constant 0 : i32
    return %arg0, %c0_i32, %c0_i32_0 : i32, i32, i32
  }
  func.func @transform_3(%arg0: i32) -> (i32, i32) {
    %c0_i32 = arith.constant 0 : i32
    %c0_i32_0 = arith.constant 0 : i32
    %c0_i32_1 = arith.constant 0 : i32
    return %c0_i32, %c0_i32_0 : i32, i32
  }
  func.func @transform_4(%arg0: i32) -> (i32, i32) {
    %c0_i32 = arith.constant 0 : i32
    %c0_i32_0 = arith.constant 0 : i32
    %c0_i32_1 = arith.constant 0 : i32
    return %c0_i32, %c0_i32_0 : i32, i32
  }
  func.func @transform_5(%arg0: i32) -> (i32, i32) {
    %c0_i32 = arith.constant 0 : i32
    %c0_i32_0 = arith.constant 0 : i32
    %c0_i32_1 = arith.constant 0 : i32
    return %c0_i32, %c0_i32_0 : i32, i32
  }
  func.func @transform_6(%arg0: i32) -> (i32, i32) {
    %c0_i32 = arith.constant 0 : i32
    %c0_i32_0 = arith.constant 0 : i32
    %c0_i32_1 = arith.constant 0 : i32
    return %c0_i32, %c0_i32_0 : i32, i32
  }
  func.func @transform_7(%arg0: i32) -> (i32, i32) {
    %c0_i32 = arith.constant 0 : i32
    %c0_i32_0 = arith.constant 0 : i32
    %c0_i32_1 = arith.constant 0 : i32
    return %c0_i32, %c0_i32_0 : i32, i32
  }
  func.func @transform_8(%arg0: i32) -> (i32, i32) {
    %c0_i32 = arith.constant 0 : i32
    %c0_i32_0 = arith.constant 0 : i32
    %c0_i32_1 = arith.constant 0 : i32
    return %c0_i32, %c0_i32_0 : i32, i32
  }
  func.func @transform_9(%arg0: i32) -> (i32, i32) {
    %c0_i32 = arith.constant 0 : i32
    %c0_i32_0 = arith.constant 0 : i32
    %c0_i32_1 = arith.constant 0 : i32
    return %c0_i32, %c0_i32_0 : i32, i32
  }
  func.func @transform_10(%arg0: i32) -> (i32, i32) {
    %c0_i32 = arith.constant 0 : i32
    %c0_i32_0 = arith.constant 0 : i32
    %c0_i32_1 = arith.constant 0 : i32
    return %c0_i32, %c0_i32_0 : i32, i32
  }
  func.func @transform_11(%arg0: i32) -> (i32, i32) {
    %c0_i32 = arith.constant 0 : i32
    %c0_i32_0 = arith.constant 0 : i32
    %c0_i32_1 = arith.constant 0 : i32
    return %c0_i32, %c0_i32_0 : i32, i32
  }
  func.func @transform_12(%arg0: i32) -> (i32, i32) {
    %c0_i32 = arith.constant 0 : i32
    %c0_i32_0 = arith.constant 0 : i32
    %c0_i32_1 = arith.constant 0 : i32
    return %c0_i32, %c0_i32_0 : i32, i32
  }
  func.func @transform_13(%arg0: i32) -> (i32, i32) {
    %c0_i32 = arith.constant 0 : i32
    %c0_i32_0 = arith.constant 0 : i32
    %c0_i32_1 = arith.constant 0 : i32
    return %c0_i32, %c0_i32_0 : i32, i32
  }
  func.func @transform_14(%arg0: i32) -> (i32, i32, i32) {
    %c0_i32 = arith.constant 0 : i32
    %c0_i32_0 = arith.constant 0 : i32
    %c0_i32_1 = arith.constant 0 : i32
    return %arg0, %c0_i32, %c0_i32_0 : i32, i32, i32
  }
}

module attributes {stable_mosaic.version = 11 : i64} {
  func.func @_ffn_block_kernel(%arg0: i32, %arg1: memref<8x32xf32, #tpu.memory_space<vmem>>, %arg2: memref<32x128xf32, #tpu.memory_space<vmem>>, %arg3: memref<1x128xf32, #tpu.memory_space<vmem>>, %arg4: memref<128x32xf32, #tpu.memory_space<vmem>>, %arg5: memref<1x32xf32, #tpu.memory_space<vmem>>, %arg6: memref<1x32xf32, #tpu.memory_space<vmem>>, %arg7: memref<1x32xf32, #tpu.memory_space<vmem>>, %arg8: memref<8x32xf32, #tpu.memory_space<vmem>>) attributes {dimension_semantics = [#tpu.dimension_semantics<parallel>], iteration_bounds = array<i64: 2>, scalar_prefetch = 0 : i64, scratch_operands = 0 : i64, tpu.core_type = #tpu.core_type<tc>, window_params = [{transform_indices = @transform_0, window_bounds = array<i64: 8, 32>}, {pipeline_mode = #tpu.pipeline_mode<synchronous>, transform_indices = @transform_1, window_bounds = array<i64: 32, 128>}, {pipeline_mode = #tpu.pipeline_mode<synchronous>, transform_indices = @transform_2, window_bounds = array<i64: 1, 128>}, {pipeline_mode = #tpu.pipeline_mode<synchronous>, transform_indices = @transform_3, window_bounds = array<i64: 128, 32>}, {pipeline_mode = #tpu.pipeline_mode<synchronous>, transform_indices = @transform_4, window_bounds = array<i64: 1, 32>}, {pipeline_mode = #tpu.pipeline_mode<synchronous>, transform_indices = @transform_5, window_bounds = array<i64: 1, 32>}, {pipeline_mode = #tpu.pipeline_mode<synchronous>, transform_indices = @transform_6, window_bounds = array<i64: 1, 32>}, {transform_indices = @transform_7, window_bounds = array<i64: 8, 32>}]} {
    %c0 = arith.constant 0 : index
    %c0_0 = arith.constant 0 : index
    %0 = vector.load %arg1[%c0, %c0_0] : memref<8x32xf32, #tpu.memory_space<vmem>>, vector<8x32xf32>
    %c0_1 = arith.constant 0 : index
    %c0_2 = arith.constant 0 : index
    %1 = vector.load %arg2[%c0_1, %c0_2] : memref<32x128xf32, #tpu.memory_space<vmem>>, vector<32x128xf32>
    %cst = arith.constant dense<0.000000e+00> : vector<8x128xf32>
    %2 = tpu.matmul %0, %1, %cst {dimension_numbers = #tpu.dot_dimension_numbers<[1], [0], [0], [1], [0, 0, 1, 1], [], []>} : vector<8x32xf32>, vector<32x128xf32>, vector<8x128xf32> -> vector<8x128xf32>
    %c0_3 = arith.constant 0 : index
    %c0_4 = arith.constant 0 : index
    %3 = vector.load %arg3[%c0_3, %c0_4] : memref<1x128xf32, #tpu.memory_space<vmem>>, vector<1x128xf32>
    %4 = vector.broadcast %3 : vector<1x128xf32> to vector<8x128xf32>
    %5 = arith.addf %2, %4 : vector<8x128xf32>
    %cst_5 = arith.constant 0.000000e+00 : f32
    %6 = vector.broadcast %cst_5 : f32 to vector<8x128xf32>
    %7 = arith.maximumf %5, %6 : vector<8x128xf32>
    %c0_6 = arith.constant 0 : index
    %c0_7 = arith.constant 0 : index
    %8 = vector.load %arg4[%c0_6, %c0_7] : memref<128x32xf32, #tpu.memory_space<vmem>>, vector<128x32xf32>
    %cst_8 = arith.constant dense<0.000000e+00> : vector<8x32xf32>
    %9 = tpu.matmul %7, %8, %cst_8 {dimension_numbers = #tpu.dot_dimension_numbers<[1], [0], [0], [1], [0, 0, 1, 1], [], []>} : vector<8x128xf32>, vector<128x32xf32>, vector<8x32xf32> -> vector<8x32xf32>
    %c0_9 = arith.constant 0 : index
    %c0_10 = arith.constant 0 : index
    %10 = vector.load %arg5[%c0_9, %c0_10] : memref<1x32xf32, #tpu.memory_space<vmem>>, vector<1x32xf32>
    %11 = vector.broadcast %10 : vector<1x32xf32> to vector<8x32xf32>
    %12 = arith.addf %9, %11 : vector<8x32xf32>
    %13 = arith.addf %0, %12 : vector<8x32xf32>
    %cst_11 = arith.constant dense<0.000000e+00> : vector<8xf32>
    %14 = vector.multi_reduction <add>, %13, %cst_11 [1] : vector<8x32xf32> to vector<8xf32>
    %15 = vector.shape_cast %14 : vector<8xf32> to vector<8x1xf32>
    %cst_12 = arith.constant 3.200000e+01 : f32
    %16 = vector.broadcast %cst_12 : f32 to vector<8x1xf32>
    %17 = arith.divf %15, %16 : vector<8x1xf32>
    %18 = vector.broadcast %17 : vector<8x1xf32> to vector<8x32xf32>
    %19 = arith.subf %13, %18 : vector<8x32xf32>
    %20 = arith.mulf %19, %19 : vector<8x32xf32>
    %cst_13 = arith.constant dense<0.000000e+00> : vector<8xf32>
    %21 = vector.multi_reduction <add>, %20, %cst_13 [1] : vector<8x32xf32> to vector<8xf32>
    %22 = vector.shape_cast %21 : vector<8xf32> to vector<8x1xf32>
    %cst_14 = arith.constant 3.200000e+01 : f32
    %23 = vector.broadcast %cst_14 : f32 to vector<8x1xf32>
    %24 = arith.divf %22, %23 : vector<8x1xf32>
    %cst_15 = arith.constant 9.99999974E-6 : f32
    %25 = vector.broadcast %cst_15 : f32 to vector<8x1xf32>
    %26 = arith.addf %24, %25 : vector<8x1xf32>
    %27 = math.rsqrt %26 : vector<8x1xf32>
    %28 = vector.broadcast %27 : vector<8x1xf32> to vector<8x32xf32>
    %29 = arith.mulf %19, %28 : vector<8x32xf32>
    %c0_16 = arith.constant 0 : index
    %c0_17 = arith.constant 0 : index
    %30 = vector.load %arg6[%c0_16, %c0_17] : memref<1x32xf32, #tpu.memory_space<vmem>>, vector<1x32xf32>
    %31 = vector.broadcast %30 : vector<1x32xf32> to vector<8x32xf32>
    %32 = arith.mulf %29, %31 : vector<8x32xf32>
    %c0_18 = arith.constant 0 : index
    %c0_19 = arith.constant 0 : index
    %33 = vector.load %arg7[%c0_18, %c0_19] : memref<1x32xf32, #tpu.memory_space<vmem>>, vector<1x32xf32>
    %34 = vector.broadcast %33 : vector<1x32xf32> to vector<8x32xf32>
    %35 = arith.addf %32, %34 : vector<8x32xf32>
    %c0_20 = arith.constant 0 : index
    %c0_21 = arith.constant 0 : index
    %36 = vector.load %arg8[%c0_20, %c0_21] : memref<8x32xf32, #tpu.memory_space<vmem>>, vector<8x32xf32>
    tpu.vector_store %arg8[%c0_20, %c0_21], %35 {strides = array<i32>} : memref<8x32xf32, #tpu.memory_space<vmem>>, vector<8x32xf32>,
    return
  }
  func.func @transform_0(%arg0: i32) -> (i32, i32) {
    %c0_i32 = arith.constant 0 : i32
    %c0_i32_0 = arith.constant 0 : i32
    return %arg0, %c0_i32 : i32, i32
  }
  func.func @transform_1(%arg0: i32) -> (i32, i32) {
    %c0_i32 = arith.constant 0 : i32
    %c0_i32_0 = arith.constant 0 : i32
    %c0_i32_1 = arith.constant 0 : i32
    return %c0_i32, %c0_i32_0 : i32, i32
  }
  func.func @transform_2(%arg0: i32) -> (i32, i32) {
    %c0_i32 = arith.constant 0 : i32
    %c0_i32_0 = arith.constant 0 : i32
    %c0_i32_1 = arith.constant 0 : i32
    return %c0_i32, %c0_i32_0 : i32, i32
  }
  func.func @transform_3(%arg0: i32) -> (i32, i32) {
    %c0_i32 = arith.constant 0 : i32
    %c0_i32_0 = arith.constant 0 : i32
    %c0_i32_1 = arith.constant 0 : i32
    return %c0_i32, %c0_i32_0 : i32, i32
  }
  func.func @transform_4(%arg0: i32) -> (i32, i32) {
    %c0_i32 = arith.constant 0 : i32
    %c0_i32_0 = arith.constant 0 : i32
    %c0_i32_1 = arith.constant 0 : i32
    return %c0_i32, %c0_i32_0 : i32, i32
  }
  func.func @transform_5(%arg0: i32) -> (i32, i32) {
    %c0_i32 = arith.constant 0 : i32
    %c0_i32_0 = arith.constant 0 : i32
    %c0_i32_1 = arith.constant 0 : i32
    return %c0_i32, %c0_i32_0 : i32, i32
  }
  func.func @transform_6(%arg0: i32) -> (i32, i32) {
    %c0_i32 = arith.constant 0 : i32
    %c0_i32_0 = arith.constant 0 : i32
    %c0_i32_1 = arith.constant 0 : i32
    return %c0_i32, %c0_i32_0 : i32, i32
  }
  func.func @transform_7(%arg0: i32) -> (i32, i32) {
    %c0_i32 = arith.constant 0 : i32
    %c0_i32_0 = arith.constant 0 : i32
    return %arg0, %c0_i32 : i32, i32
  }
}

</mosaic_0001>

<bundles_post_ra>
// kernel: decoder_block.3
= control target key start
LH: loop header
LB: loop body
LE: loop exit
PB: predicated region body
PF: predicated region fallthrough
CT: control target
= control target key end

     0   :  { %s1908_s0 = inlined_call_operand.vmem [shape: f32[2,8,32], index: 0, kind: input, shape index: {}, may-alias: {0,1,2}]   ;;  %s1909_s1 = inlined_call_operand.vmem [shape: f32[2,8,32], index: 1, kind: input, shape index: {}, may-alias: {0,1,2}]   ;;  %s1910_s2 = inlined_call_operand.vmem [shape: f32[2,8,32], index: 2, kind: input, shape index: {}, may-alias: {0,1,2}]   ;;  %s1911_s3 = inlined_call_operand.vmem [shape: f32[8,8], index: 3, kind: input, shape index: {}]   ;;  %s1912_s4 = inlined_call_operand.hbm [shape: f32[32,32], index: 4, kind: input, shape index: {}]   ;;  %s1913_s5 = inlined_call_operand.hbm [shape: f32[1,32], index: 5, kind: input, shape index: {}]   ;;  %s1914_s6 = inlined_call_operand.hbm [shape: f32[32,32], index: 6, kind: input, shape index: {}]   ;;  %s1915_s7 = inlined_call_operand.hbm [shape: f32[1,32], index: 7, kind: input, shape index: {}]   ;;  %s1916_s8 = inlined_call_operand.hbm [shape: f32[32,32], index: 8, kind: input, shape index: {}]   ;;  %s1917_s9 = inlined_call_operand.hbm [shape: f32[1,32], index: 9, kind: input, shape index: {}]   ;;  %s1918_s10 = inlined_call_operand.hbm [shape: f32[32,32], index: 10, kind: input, shape index: {}]   ;;  %s1919_s11 = inlined_call_operand.hbm [shape: f32[1,32], index: 11, kind: input, shape index: {}]   ;;  %s1920_s12 = inlined_call_operand.vmem [shape: f32[1,32], index: 12, kind: input, shape index: {}]   ;;  %s1921_s13 = inlined_call_operand.vmem [shape: f32[1,32], index: 13, kind: input, shape index: {}]   ;;  %s1922_s14 = inlined_call_operand.vmem [shape: f32[2,8,32], index: 14, kind: output, shape index: {}]  }
   0x1   :  { %1923 = sst [smem:[#allocation20_spill]] %s1912_s4 }
   0x2   :  { %1924 = sst [smem:[#allocation21_spill]] %s1913_s5 }
   0x3   :  { %1925 = sst [smem:[#allocation22_spill]] %s1915_s7 }
   0x4   :  { %19 = vsyncpa [#allocation3], 0 }
   0x5   :  { %20 = vsyncpa [#allocation5], 0 }
   0x6   :  { %21 = vsyncpa [#allocation8], 0 }
   0x7   :  { %22 = vsyncpa [#allocation11], 0 }
   0x8   :  { %23 = vsyncpa [#allocation14], 0  ;;  %s1750_s29 = smov 0  }
   0x9 LB: > { %s1926_s5 = sld [smem:[#allocation21_spill]]  ;;  %s1759_s17 = sadd.s32 4294967295, %s1656_s29   ;;  %s1656_s29 = sphi %s1750_s29, %s29_s29  }
   0xa   : > { %p1225_p0 = scmp.ge.s32.totalorder %s1656_s29, 1  ;;  %p369_p1 = scmp.lt.s32.totalorder %s1656_s29, 3 }
   0xb   : > { %p1323_p2 = scmp.eq.s32.totalorder %s1759_s17, 0  ;;  %s1658_s19 = smov [#allocation4]  }
   0xc   : > { %p1764_p3 = pnand %p1225_p0, %p369_p1  ;;  %s400_s20 = sshll.u32 %s1658_s19, 4  ;;  %s401_s20 = int_to_ptr.vmem [resolvable:$true] %s400_s20 }
   0xd   : > { %s1928_s7 = sld [smem:[#allocation22_spill]]  ;;  %s450_s26 = sshll.u32 %s1917_s9, 4  ;;  %s451_s26 = int_to_ptr.hbm [resolvable:$true] %s450_s26 }
   0xe   : > { %p1298_p4 = pneg %p1764_p3  ;;  %s1659_s28 = smov [#allocation7]  }
   0xf   : > { %s398_s16 = sshll.u32 %s1926_s5, 4  ;;  %s426_s30 = sshll.u32 %s1659_s28, 4  ;;  %s399_s16 = int_to_ptr.hbm [resolvable:$true] %s398_s16  ;;  %s427_s30 = int_to_ptr.vmem [resolvable:$true] %s426_s30 }
  0x10   : > { %p1778_p5 = pnand %p1323_p2, %p1298_p4  ;;  %s1660_s15 = smov [#allocation10]  }
  0x11   : > { %s452_s19 = sshll.u32 %s1660_s15, 4  ;;  %s1930_s4 = sld [smem:[#allocation20_spill]]  ;;  %s453_s19 = int_to_ptr.vmem [resolvable:$true] %s452_s19 }
  0x12   : > { %1304 = dma.hbm_to_vmem [thread:$0]  (!%p1778_p5), %s399_s16, 16, %s401_s20, [#allocation5]  }
  0x13   : > { %s424_s23 = sshll.u32 %s1928_s7, 4  ;;  %s1661_s25 = smov [#allocation2]   ;;  %s425_s23 = int_to_ptr.hbm [resolvable:$true] %s424_s23 }
  0x14   : > { %1310 = dma.hbm_to_vmem [thread:$0]  (!%p1778_p5), %s425_s23, 16, %s427_s30, [#allocation8]  }
  0x15   : > { %1316 = dma.hbm_to_vmem [thread:$0]  (!%p1778_p5), %s451_s26, 16, %s453_s19, [#allocation11]  }
  0x16   : > { %s385_s28 = sshll.u32 %s1661_s25, 4  ;;  %s409_s16 = sshll.u32 %s1914_s6, 4  ;;  %s386_s28 = int_to_ptr.vmem [resolvable:$true] %s385_s28  ;;  %s410_s16 = int_to_ptr.hbm [resolvable:$true] %s409_s16 }
  0x17   : > { %s383_s24 = sshll.u32 %s1930_s4, 4  ;;  %s1662_s20 = smov 128   ;;  %s384_s24 = int_to_ptr.hbm [resolvable:$true] %s383_s24 }
  0x18   : > { %s1663_s23 = smov 8   ;;  %s1664_s30 = smov [#allocation6]  }
  0x19   : > { %1301 = dma.hbm_to_vmem [thread:$0]  (!%p1778_p5), %s384_s24, 512, %s386_s28, [#allocation3], %s1662_s20, %s1662_s20, %s1663_s23  }
  0x1a   : > { %s411_s15 = sshll.u32 %s1664_s30, 4  ;;  %s435_s26 = sshll.u32 %s1916_s8, 4  ;;  %s412_s15 = int_to_ptr.vmem [resolvable:$true] %s411_s15  ;;  %s436_s26 = int_to_ptr.hbm [resolvable:$true] %s435_s26 }
  0x1b   : > { %1307 = dma.hbm_to_vmem [thread:$0]  (!%p1778_p5), %s410_s16, 512, %s412_s15, [#allocation5], %s1662_s20, %s1662_s20, %s1663_s23  }
  0x1c   : > { %s461_s7 = sshll.u32 %s1918_s10, 4  ;;  %s1665_s25 = smov [#allocation9]   ;;  %s462_s7 = int_to_ptr.hbm [resolvable:$true] %s461_s7 }
  0x1d   : > { %s437_s4 = sshll.u32 %s1665_s25, 4  ;;  %s1666_s24 = smov [#allocation12]   ;;  %s438_s4 = int_to_ptr.vmem [resolvable:$true] %s437_s4 }
  0x1e   : > { %1313 = dma.hbm_to_vmem [thread:$0]  (!%p1778_p5), %s436_s26, 512, %s438_s4, [#allocation8], %s1662_s20, %s1662_s20, %s1663_s23  }
  0x1f   : > { %s463_s28 = sshll.u32 %s1666_s24, 4  ;;  %s476_s22 = sshll.u32 %s1919_s11, 4  ;;  %s464_s28 = int_to_ptr.vmem [resolvable:$true] %s463_s28  ;;  %s477_s22 = int_to_ptr.hbm [resolvable:$true] %s476_s22 }
  0x20   : > { %1319 = dma.hbm_to_vmem [thread:$0]  (!%p1778_p5), %s462_s7, 512, %s464_s28, [#allocation11], %s1662_s20, %s1662_s20, %s1663_s23  }
  0x21   : > { %s1667_s16 = smov [#allocation13]   ;;  %518 = sbr.rel (%p1764_p3) target bundleno = 1353 (0x549), region = 76 }
  0x22   : > { %s478_s15 = sshll.u32 %s1667_s16, 4  ;;  %s479_s15 = int_to_ptr.vmem [resolvable:$true] %s478_s15 }
  0x23   : > { %1322 = dma.hbm_to_vmem [thread:$0]  (!%p1778_p5), %s477_s22, 16, %s479_s15, [#allocation14]  }
  0x26   : > { %1635 = dma.done.wait (%p1323_p2), [#allocation3], 512  }
  0x27   : > { %1637 = vsyncadd (%p1323_p2), [#allocation3], 4294966784 }
  0x28   : > { %1639 = dma.done.wait (%p1323_p2), [#allocation5], 528  }
  0x29   : > { %1641 = vsyncadd (%p1323_p2), [#allocation5], 4294966768 }
  0x2a   : > { %1643 = dma.done.wait (%p1323_p2), [#allocation8], 528  }
  0x2b   : > { %1645 = vsyncadd (%p1323_p2), [#allocation8], 4294966768 }
  0x2c   : > { %1647 = dma.done.wait (%p1323_p2), [#allocation11], 528  }
  0x2d   : > { %1649 = vsyncadd (%p1323_p2), [#allocation11], 4294966768 }
  0x2e   : > { %1651 = dma.done.wait (%p1323_p2), [#allocation14], 16  }
  0x2f   : > { %1653 = vsyncadd (%p1323_p2), [#allocation14], 4294967280  ;;  %p606_p6 = scmp.lt.s32.totalorder %s1759_s17, 1  ;;  %v660_v0 = vld [vmem:[#allocation6 + $0x18] sm:$0xff]  ;;  %v659_v2 = vld [vmem:[#allocation6 + $0x10] sm:$0xff]  ;;  %vm633_vm0 = vcmask 261120  }
  0x30   : > { %v628_v1 = vld [vmem:[#allocation2 + $0x18] sm:$0xff]  ;;  %680 = vmatpush.msra.mxu1 %v660_v0  ;;  %v627_v3 = vld [vmem:[#allocation2 + $0x10] sm:$0xff]  ;;  %v626_v5 = vld [vmem:[#allocation2 + $0x8] sm:$0xff]  ;;  %vm721_vm1 = vcmask 64512   ;;  %s1668_s19 = smov 104   ;;  %s1669_s5 = smov 120  }
  0x31   : > { %s1932_s17 = smov (!%p606_p6, %s1759_s17), 1  ;;  %649 = vmatpush.msra.mxu0 %v628_v1  ;;  %v658_v4 = vld [vmem:[#allocation6 + $0x8] sm:$0xff]  ;;  %v657_v6 = vld [vmem:[#allocation6] sm:$0xff]  ;;  %v1365_v11 = vld [vmem:[#allocation4] ss:$0 sm:$0xff]  ;;  %s1670_s7 = smov 112  }
  0x32   : > { %s1837_s4 = sshll.u32 %s1932_s17, 3  ;;  %681 = vmatpush.msra.mxu1 %v659_v2  ;;  %v625_v7 = vld [vmem:[#allocation2] sm:$0xff]  ;;  %v690_v18 = vld [vmem:[#allocation9 + $0x10] sm:$0xff]  ;;  %v689_v19 = vld [vmem:[#allocation9 + $0x8] sm:$0xff]  ;;  %s1671_s22 = smov 16   ;;  %vm991_vm2 = vcmask 130048  }
  0x33   : > { %s613_s20 = scalar_lea.vmem %s1909_s1, %s1837_s4  ;;  %s609_s17 = scalar_lea.vmem %s1908_s0, %s1837_s4  ;;  %650 = vmatpush.msra.mxu0 %v627_v3  ;;  %v1364_v10 = vld [vmem:[#allocation7] ss:$0 sm:$0xff]  ;;  %v688_v20 = vld [vmem:[#allocation9] sm:$0xff]  ;;  %vm993_vm3 = vcmask 195584  }
  0x34   : > { %v623_v8 = vld [vmem:[%s613_s20] sm:$0xff]  ;;  %682 = vmatpush.msra.mxu1 %v658_v4  ;;  %s617_s28 = scalar_lea.vmem %s1910_s2, %s1837_s4  ;;  %s1672_s16 = smov 8  }
  0x35   : > { %651 = vmatpush.msra.mxu0 %v626_v5  ;;  %v1847_v9 = vld [vmem:[%s609_s17] sm:$0xff]  ;;  %s1673_s15 = smov 24  }
  0x36   : > { %683 = vmatpush.msra.mxu1 %v657_v6  ;;  %v691_v17 = vld [vmem:[#allocation9 + $0x18] sm:$0xff]  ;;  %v1366_v32 = vld [vmem:[#allocation10] ss:$0 sm:$0xff] }
  0x37   : > { %652 = vmatpush.msra.mxu0 %v625_v7  ;;  %1249 = vmatmul.msk.f32.vlgmr.msra.gmra.mxu1 %vm633_vm0, %v623_v8  ;;  %v624_v21 = vld [vmem:[%s617_s28] sm:$0xff] }
  0x38   : > { %1248 = vmatmul.msk.f32.vlgmr.msra.gmra.mxu0 %vm633_vm0, %v1847_v9  ;;  %711 = vmatpush.msra.mxu2 %v691_v17  ;;  %v720_v28 = vld [vmem:[%s1911_s3] sm:$0xff] }
  0x3a   : > { %712 = vmatpush.msra.mxu2 %v690_v18 }
  0x3c   : > { %713 = vmatpush.msra.mxu2 %v689_v19 }
  0x3e   : > { %714 = vmatpush.msra.mxu2 %v688_v20  ;;  %v998_v20 = vld [vmem:[#allocation12 + $0x18] sm:$0xff] }
  0x3f   : > { %1250 = vmatmul.msk.f32.vlgmr.msra.gmra.mxu2 %vm633_vm0, %v624_v21  ;;  %v997_v21 = vld [vmem:[#allocation12 + $0x10] sm:$0xff] }
  0xb4   : > { %v685_v12 = vpop.f32.mrf.mxu1 }
  0xb5   : > { %v654_v13 = vpop.f32.mrf.mxu0  ;;  %v686_v14 = vadd.f32 %v1364_v10, %v685_v12 }
  0xb6   : > { %v655_v15 = vadd.f32 %v1365_v11, %v654_v13 }
  0xb7   : > { %915 = vrot.lane.b32.xlu2 %v686_v14, %s1668_s19  ;;  %784 = vrot.lane.b32.xlu1 %v686_v14, %s1669_s5 }
  0xb8   : > { %v719_v16 = vmul.f32 0.17677669, %v655_v15  ;;  %850 = vrot.lane.b32.xlu0 %v686_v14, %s1670_s7  ;;  %1251 = vmatpush.xpose.msk.msra.mxu3 %vm721_vm1, %v686_v14 }
  0xbb   : > { %1252 = vmatmul.msk.f32.vlgmr.msra.gmra.mxu3 %vm721_vm1, %v719_v16 }
  0xbf   : > { %913 = vrot.lane.b32.xlu2 %v719_v16, %s1668_s19  ;;  %782 = vrot.lane.b32.xlu1 %v719_v16, %s1669_s5 }
  0xc0   : > { %848 = vrot.lane.b32.xlu0 %v719_v16, %s1670_s7 }
  0xc2   : > { %v716_v33 = vpop.f32.mrf.mxu2 }
  0xc3   : > { %v717_v34 = vadd.f32 %v1366_v32, %v716_v33 }
  0xc5   : > { %777 = vmatpush.msrb.mxu3 %v717_v34 }
 0x111   : > { %v916_v23 = vpop.permute.xlu2 %915 }
 0x119   : > { %v914_v27 = vpop.permute.xlu2 %913 }
 0x129   : > { %v785_v22 = vpop.permute.xlu1 %784 }
 0x12a   : > { %v851_v24 = vpop.permute.xlu0 %850  ;;  %1254 = vmatpush.xpose.msk.msrb.mxu0 %vm721_vm1, %v785_v22  ;;  %v996_v22 = vld [vmem:[#allocation12 + $0x8] sm:$0xff] }
 0x12b   : > { %1257 = vmatpush.xpose.msk.msrb.mxu2 %vm721_vm1, %v851_v24 }
 0x12e   : > { %1260 = vmatpush.xpose.msk.msra.mxu0 %vm721_vm1, %v916_v23  ;;  %v995_v23 = vld [vmem:[#allocation12] sm:$0xff] }
 0x12f   : > { %1018 = vmatpush.msra.mxu2 %v998_v20 }
 0x131   : > { %v783_v25 = vpop.permute.xlu1 %782  ;;  %1019 = vmatpush.msra.mxu2 %v997_v21 }
 0x132   : > { %v849_v26 = vpop.permute.xlu0 %848  ;;  %1255 = vmatmul.msk.f32.vlgmr.msrb.gmra.mxu0 %vm721_vm1, %v783_v25 }
 0x133   : > { %1258 = vmatmul.msk.f32.vlgmr.msrb.gmra.mxu2 %vm721_vm1, %v849_v26 }
 0x134   : > { %1020 = vmatpush.msra.mxu2 %v996_v22 }
 0x136   : > { %1021 = vmatpush.msra.mxu2 %v995_v23 }
 0x13a   : > { %1261 = vmatmul.msk.f32.vlgmr.msra.gmra.mxu0 %vm721_vm1, %v914_v27 }
 0x13e   : > { %v745_v29 = vpop.f32.mrf.mxu3 }
 0x13f   : > { %v746_v30 = vadd.f32 %v745_v29, %v720_v28 }
 0x141   : > { %v748_v31 = vsel %vm721_vm1, %v746_v30, -inf }
 0x142   : > { %749 = vmax.xlane.f32.xlu0 %v748_v31 }
 0x1af   : > { %v807_v35 = vpop.f32.mrf.mxu0 }
 0x1b0   : > { %v808_v36 = vadd.f32 %v807_v35, %v720_v28  ;;  %v1674_v35 = vmov 32.0  }
 0x1b2   : > { %v810_v37 = vsel %vm721_vm1, %v808_v36, -inf }
 0x1b3   : > { %811 = vmax.xlane.f32.xlu1 %v810_v37 }
 0x1b5   : > { %v750_v38 = vpop.xlane.xlu0 %749 }
 0x1b6   : > { %v751_v39 = vsub.f32 %v746_v30, %v750_v38  ;;  %v873_v40 = vpop.f32.mrf.mxu2  ;;  %v1367_v30 = vld [vmem:[#allocation13] ss:$0 sm:$0xff] }
 0x1b7   : > { %v874_v41 = vadd.f32 %v873_v40, %v720_v28  ;;  %v938_v44 = vpop.f32.mrf.mxu0 }
 0x1b8   : > { %v752_v42 = vmul.f32 1.442695, %v751_v39  ;;  %v939_v45 = vadd.f32 %v938_v44, %v720_v28 }
 0x1b9   : > { %v876_v43 = vsel %vm721_vm1, %v874_v41, -inf }
 0x1ba   : > { %1370 = vpow2.f32 %v752_v42  ;;  %877 = vmax.xlane.f32.xlu2 %v876_v43  ;;  %v941_v47 = vsel %vm721_vm1, %v939_v45, -inf }
 0x1c0   : > { %v1371_v46 = vpop.eup %1370 }
 0x1c1   : > { %v754_v48 = vsel %vm721_vm1, %v1371_v46, 0.0 }
 0x1c2   : > { %942 = vmax.xlane.f32.xlu2 %v941_v47  ;;  %755 = vadd.xlane.f32.xlu0 %v754_v48 }
 0x226   : > { %v812_v49 = vpop.xlane.xlu1 %811 }
 0x227   : > { %v813_v50 = vsub.f32 %v808_v36, %v812_v49 }
 0x229   : > { %v814_v51 = vmul.f32 1.442695, %v813_v50 }
 0x22b   : > { %1372 = vpow2.f32 %v814_v51 }
 0x22d   : > { %v878_v52 = vpop.xlane.xlu2 %877 }
 0x22e   : > { %v879_v53 = vsub.f32 %v874_v41, %v878_v52 }
 0x230   : > { %v880_v54 = vmul.f32 1.442695, %v879_v53 }
 0x231   : > { %v1373_v55 = vpop.eup %1372 }
 0x232   : > { %1374 = vpow2.f32 %v880_v54  ;;  %v816_v56 = vsel %vm721_vm1, %v1373_v55, 0.0 }
 0x233   : > { %817 = vadd.xlane.f32.xlu1 %v816_v56 }
 0x235   : > { %v943_v57 = vpop.xlane.xlu2 %942  ;;  %v756_v58 = vpop.xlane.xlu0 %755 }
 0x236   : > { %v944_v59 = vsub.f32 %v939_v45, %v943_v57  ;;  %1376 = vrcp.f32 %v756_v58  ;;  %v1369_v57 = vld [vmem:[%s1921_s13] ss:$0 sm:$0xff] }
 0x238   : > { %v1375_v60 = vpop.eup %1374  ;;  %v945_v61 = vmul.f32 1.442695, %v944_v59 }
 0x239   : > { %v882_v62 = vsel %vm721_vm1, %v1375_v60, 0.0 }
 0x23a   : > { %1378 = vpow2.f32 %v945_v61  ;;  %883 = vadd.xlane.f32.xlu2 %v882_v62 }
 0x23c   : > { %v1377_v63 = vpop.eup %1376 }
 0x23d   : > { %v758_v0 = vmul.f32 %v1377_v63, %v1371_v46 }
 0x23f   : > { %1253 = vmatmul.msk.f32.vlgmr.msrb.gmra.mxu3 %vm721_vm1, %v758_v0 }
 0x240   : > { %v1379_v1 = vpop.eup %1378 }
 0x241   : > { %v947_v2 = vsel %vm721_vm1, %v1379_v1, 0.0 }
 0x242   : > { %948 = vadd.xlane.f32.xlu0 %v947_v2 }
 0x24c   : > { %822 = vrot.lane.b32.xlu1 %v717_v34, %s1669_s5 }
 0x252   : > { %887 = vrot.lane.b32.xlu2 %v717_v34, %s1670_s7 }
 0x256   : > { %952 = vrot.lane.b32.xlu0 %v717_v34, %s1668_s19  ;;  %s621_s19 = scalar_lea.vmem %s1922_s14, %s1837_s4 }
 0x2a6   : > { %v818_v4 = vpop.xlane.xlu1 %817 }
 0x2ad   : > { %v884_v3 = vpop.xlane.xlu2 %883 }
 0x2ae   : > { %1380 = vrcp.f32 %v884_v3 }
 0x2af   : > { %1382 = vrcp.f32 %v818_v4 }
 0x2b4   : > { %v1381_v5 = vpop.eup %1380 }
 0x2b5   : > { %v886_v6 = vmul.f32 %v1381_v5, %v1375_v60  ;;  %v888_v7 = vpop.permute.xlu2 %887  ;;  %v1383_v8 = vpop.eup %1382 }
 0x2b6   : > { %908 = vmatpush.msra.mxu3 %v888_v7  ;;  %v949_v10 = vpop.xlane.xlu0 %948  ;;  %v820_v12 = vmul.f32 %v1383_v8, %v1373_v55  ;;  %v1368_v55 = vld [vmem:[%s1920_s12] ss:$0 sm:$0xff] }
 0x2b7   : > { %1259 = vmatmul.msk.f32.vlgmr.msra.gmra.mxu3 %vm721_vm1, %v886_v6  ;;  %1384 = vrcp.f32 %v949_v10 }
 0x2b8   : > { %1386 = vrcp.f32 %v1674_v35 }
 0x2bd   : > { %v1385_v13 = vpop.eup %1384 }
 0x2be   : > { %v823_v11 = vpop.permute.xlu1 %822  ;;  %v951_v14 = vmul.f32 %v1385_v13, %v1379_v1  ;;  %v1387_v36 = vpop.eup %1386 }
 0x2bf   : > { %843 = vmatpush.msrb.mxu1 %v823_v11  ;;  %v1031_v37 = vmul.f32 32.0, %v1387_v36  ;;  %vm1035_vm4 = vweird.f32 %v1387_v36 }
 0x2c0   : > { %1256 = vmatmul.msk.f32.vlgmr.msrb.gmra.mxu1 %vm721_vm1, %v820_v12 }
 0x2c1   : > { %v1032_v38 = vsub.f32 1.0, %v1031_v37 }
 0x2c2   : > { %v779_v16 = vpop.f32.mrf.mxu3 }
 0x2c3   : > { %v1033_v39 = vmul.f32 %v1387_v36, %v1032_v38 }
 0x2c5   : > { %v1034_v40 = vadd.f32 %v1387_v36, %v1033_v39 }
 0x2c7   : > { %v1036_v41 = vsel %vm1035_vm4, %v1387_v36, %v1034_v40 }
 0x2c8   : > { %v953_v15 = vpop.permute.xlu0 %952 }
 0x2c9   : > { %973 = vmatpush.msra.mxu1 %v953_v15 }
 0x2ca   : > { %1262 = vmatmul.msk.f32.vlgmr.msra.gmra.mxu1 %vm721_vm1, %v951_v14 }
 0x33a   : > { %v910_v17 = vpop.f32.mrf.mxu3 }
 0x33b   : > { %983 = vrot.lane.b32.xlu0 %v910_v17, %s1671_s22 }
 0x33d   : > { %v845_v18 = vpop.f32.mrf.mxu1 }
 0x33e   : > { %979 = vrot.lane.b32.xlu1 %v845_v18, %s1672_s16 }
 0x347   : > { %v975_v19 = vpop.f32.mrf.mxu1 }
 0x348   : > { %987 = vrot.lane.b32.xlu2 %v975_v19, %s1673_s15 }
 0x3a2   : > { %v988_v27 = vpop.permute.xlu2 %987 }
 0x3ad   : > { %v984_v25 = vpop.permute.xlu0 %983 }
 0x3b0   : > { %v980_v24 = vpop.permute.xlu1 %979 }
 0x3b1   : > { %v990_v26 = vsel %vm721_vm1, %v779_v16, %v980_v24 }
 0x3b2   : > { %v992_v28 = vsel %vm991_vm2, %v990_v26, %v984_v25 }
 0x3b3   : > { %v994_v29 = vsel %vm993_vm3, %v992_v28, %v988_v27 }
 0x3b4   : > { %1263 = vmatmul.msk.f32.vlgmr.msra.gmra.mxu2 %vm633_vm0, %v994_v29 }
 0x437   : > { %v1023_v31 = vpop.f32.mrf.mxu2 }
 0x438   : > { %v1024_v32 = vadd.f32 %v1367_v30, %v1023_v31 }
 0x43a   : > { %v1026_v33 = vadd.f32 %v1024_v32, %v1847_v9 }
 0x43c   : > { %v1027_v34 = vsel %vm633_vm0, %v1026_v33, 0.0 }
 0x43d   : > { %1028 = vadd.xlane.f32.xlu1 %v1027_v34 }
 0x4b0   : > { %v1029_v42 = vpop.xlane.xlu1 %1028 }
 0x4b1   : > { %v1037_v43 = vmul.f32 %v1036_v41, %v1029_v42 }
 0x4b3   : > { %v1038_v44 = vsub.f32 %v1026_v33, %v1037_v43 }
 0x4b5   : > { %v1039_v45 = vmul.f32 %v1038_v44, %v1038_v44 }
 0x4b7   : > { %v1040_v46 = vsel %vm633_vm0, %v1039_v45, 0.0 }
 0x4b8   : > { %1041 = vadd.xlane.f32.xlu0 %v1040_v46 }
 0x52b   : > { %v1042_v9 = vpop.xlane.xlu0 %1041 }
 0x52c   : > { %v1043_v47 = vmul.f32 %v1042_v9, %v1036_v41 }
 0x52e   : > { %v1044_v48 = vadd.f32 1e-05, %v1043_v47 }
 0x530   : > { %1388 = vrsqrt.f32 %v1044_v48  ;;  %vm1051_vm6 = vweird.f32 %v1044_v48 }
 0x536   : > { %v1389_v49 = vpop.eup %1388 }
 0x537   : > { %v1046_v50 = vmul.f32 %v1389_v49, %v1044_v48  ;;  %vm1052_vm5 = vweird.f32 %v1389_v49 }
 0x538   : > { %vm1053_vm7 = vmor %vm1051_vm6, %vm1052_vm5 }
 0x539   : > { %v1047_v51 = vmul.f32 %v1389_v49, %v1046_v50 }
 0x53b   : > { %v1048_v52 = vmul.f32 0.5, %v1047_v51 }
 0x53d   : > { %v1049_v53 = vsub.f32 1.5, %v1048_v52 }
 0x53f   : > { %v1050_v54 = vmul.f32 %v1389_v49, %v1049_v53 }
 0x541   : > { %v1054_v56 = vsel %vm1053_vm7, %v1389_v49, %v1050_v54 }
 0x542   : > { %v1055_v58 = vmul.f32 %v1054_v56, %v1038_v44 }
 0x544   : > { %v1060_v59 = vmul.f32 %v1368_v55, %v1055_v58 }
 0x546   : > { %v1065_v60 = vadd.f32 %v1369_v57, %v1060_v59 }
 0x548   : > { %1066 = vst.msk [vmem:[%s621_s19] sm:$0xff] %vm633_vm0, %v1065_v60 }
 0x549 PF: > { %s29_s29 = sadd.s32 1, %s1656_s29  }
 0x54a   : > { %p26_p7 = scmp.ge.s32.totalorder %s29_s29, 4  }
 0x54c   :  { %28 = sbr.rel (!%p26_p7) target bundleno = 9 (0x9), region = 145 }
 0x551   :  { %1086 = vsyncpa [#allocation3], 1 }
 0x552   :  { %1088 = vsyncpa [#allocation3 + $0x1], 1 }
 0x553   :  { %1089 = vsyncpa [#allocation5], 1 }
 0x554   :  { %1090 = vsyncpa [#allocation8], 1 }
 0x555   :  { %1091 = vsyncpa [#allocation11], 1 }
 0x556   :  { %1092 = vsyncpa [#allocation14], 1 }

// kernel: decoder_block.5
= control target key start
LH: loop header
LB: loop body
LE: loop exit
PB: predicated region body
PF: predicated region fallthrough
CT: control target
= control target key end

     0   :  { %12 = vsyncpa [#allocation3], 0  ;;  %s789_s0 = inlined_call_operand.vmem [shape: f32[16,32], index: 0, kind: input, shape index: {}]   ;;  %s790_s1 = inlined_call_operand.vmem [shape: f32[32,128], index: 1, kind: input, shape index: {}]   ;;  %s791_s2 = inlined_call_operand.vmem [shape: f32[1,128], index: 2, kind: input, shape index: {}]   ;;  %s792_s3 = inlined_call_operand.vmem [shape: f32[128,32], index: 3, kind: input, shape index: {}]   ;;  %s793_s4 = inlined_call_operand.vmem [shape: f32[1,32], index: 4, kind: input, shape index: {}]   ;;  %s794_s5 = inlined_call_operand.vmem [shape: f32[1,32], index: 5, kind: input, shape index: {}]   ;;  %s795_s6 = inlined_call_operand.vmem [shape: f32[1,32], index: 6, kind: input, shape index: {}]   ;;  %s796_s7 = inlined_call_operand.hbm [shape: f32[16,32], index: 7, kind: output, shape index: {}]  }
   0x1   :  { %14 = vsyncpa [#allocation3 + $0x1], 0  ;;  %s628_s24 = smov 0   ;;  %s630_s25 = smov 0  }
   0x2   :  { %s632_s26 = smov 0   ;;  %s634_s27 = smov 0  }
   0x3 LB: > { %s649_s28 = sadd.s32 4294967295, %s585_s27   ;;  %s464_s29 = sadd.s32 4294967294, %s585_s27   ;;  %s585_s27 = sphi %s634_s27, %s802_s27   ;;  %s581_s26 = sphi %s632_s26, %s801_s26   ;;  %s577_s25 = sphi %s630_s25, %s800_s25   ;;  %s573_s24 = sphi %s628_s24, %s799_s24  }
   0x4   : > { %s653_s30 = sadd.s32 1, %s585_s27   ;;  %s179_s8 = sadd.s32 1, %s581_s26 }
   0x5   : > { %s176_s9 = ssub.s32 %s585_s27, %s653_s30  ;;  %p189_p0 = scmp.ne.s32.totalorder %s581_s26, %s577_s25 }
   0x6   : > { %p177_p1 = scmp.eq.s32.totalorder %s176_s9, 0  ;;  %p190_p2 = scmp.eq.s32.totalorder %s649_s28, 1 }
   0x7   : > { %p195_p3 = scmp.ne.s32.totalorder %s577_s25, %s573_s24  ;;  %p196_p4 = scmp.eq.s32.totalorder %s464_s29, 1 }
   0x8   : > { %s664_s10 = scalar_select %p177_p1, %s581_s26, %s179_s8  }
   0x9   : > { %p666_p5 = por %p190_p2, %p189_p0  ;;  %p670_p6 = por %p196_p4, %p195_p3 }
   0xa   : > { %p467_p7 = scmp.ge.s32.totalorder %s585_s27, 1  ;;  %p239_p8 = scmp.lt.s32.totalorder %s585_s27, 3 }
   0xc   : > { %p240_p9 = pnand %p467_p7, %p239_p8 }
   0xd   : > { %p270_p10 = scmp.lt.s32.totalorder (!%p240_p9), %s649_s28, 1  ;;  %s267_s20 = sand.u32 (!%p240_p9), 1, %s577_s25  }
   0xe   : > { %243 = sbr.rel (%p240_p9) target bundleno = 558 (0x22e), region = 48  ;;  %s468_s21 = sshll.u32 (!%p240_p9), %s267_s20, 3 }
   0xf   : > { %s472_s22 = sshll.u32 (!%p240_p9), %s649_s28, 3  ;;  %s269_s16 = scalar_lea.vmem (!%p240_p9), [#allocation2], %s468_s21 }
  0x10   : > { %s400_s13 = scalar_lea.hbm (!%p240_p9), %s796_s7, %s472_s22  ;;  %s390_s18 = scalar_lea.sflag (!%p240_p9), [#allocation3], %s267_s20 }
  0x11   : > { %s543_s21 = scalar_lea.hbm (!%p240_p9), %s796_s7, 16 }
  0x13   : > { %v278_v0 = vld [vmem:[%s790_s1 + $0x18] sm:$0xff]  ;;  %v277_v1 = vld [vmem:[%s790_s1 + $0x10] sm:$0xff]  ;;  %v276_v4 = vld [vmem:[%s790_s1 + $0x8] sm:$0xff]  ;;  %s271_s23 = scalar_select %p270_p10, %s649_s28, 1  ;;  %vm283_vm0 = vcmask 261120   ;;  %v587_v30 = vmov 32.0  }
  0x14   : > { %299 = vmatpush.msra.mxu0 %v278_v0  ;;  %v323_v2 = vld [vmem:[%s792_s3 + $0x78] sm:$0xff]  ;;  %v322_v3 = vld [vmem:[%s792_s3 + $0x70] sm:$0xff]  ;;  %v321_v5 = vld [vmem:[%s792_s3 + $0x68] sm:$0xff]  ;;  %519 = vrcp.f32 %v587_v30  ;;  %s402_s28 = sshll.u32 %s269_s16, 4  ;;  %s403_s28 = int_to_ptr.vmem [resolvable:$true] %s402_s28 }
  0x15   : > { %328 = vmatpush.msra.mxu1 %v323_v2  ;;  %v275_v6 = vld [vmem:[%s790_s1] sm:$0xff]  ;;  %s469_s14 = sshll.u32 %s271_s23, 3  ;;  %v319_v9 = vld [vmem:[%s792_s3 + $0x58] sm:$0xff]  ;;  %v318_v10 = vld [vmem:[%s792_s3 + $0x50] sm:$0xff] }
  0x16   : > { %300 = vmatpush.msra.mxu0 %v277_v1  ;;  %s273_s17 = scalar_lea.vmem %s789_s0, %s469_s14  ;;  %v320_v7 = vld [vmem:[%s792_s3 + $0x60] sm:$0xff]  ;;  %v317_v11 = vld [vmem:[%s792_s3 + $0x48] sm:$0xff]  ;;  %v315_v13 = vld [vmem:[%s792_s3 + $0x38] sm:$0xff] }
  0x17   : > { %329 = vmatpush.msra.mxu1 %v322_v3  ;;  %v274_v8 = vld [vmem:[%s273_s17] sm:$0xff]  ;;  %v314_v14 = vld [vmem:[%s792_s3 + $0x30] sm:$0xff]  ;;  %v313_v15 = vld [vmem:[%s792_s3 + $0x28] sm:$0xff]  ;;  %s404_s17 = sshll.u32 %s400_s13, 4  ;;  %s405_s17 = int_to_ptr.hbm [resolvable:$true] %s404_s17 }
  0x18   : > { %301 = vmatpush.msra.mxu0 %v276_v4  ;;  %v316_v12 = vld [vmem:[%s792_s3 + $0x40] sm:$0xff]  ;;  %v311_v17 = vld [vmem:[%s792_s3 + $0x18] sm:$0xff]  ;;  %v310_v18 = vld [vmem:[%s792_s3 + $0x10] sm:$0xff]  ;;  %s537_s19 = sshra.s32 %s405_s17, 4  ;;  %s538_s19 = int_to_ptr.hbm [resolvable:$true] %s537_s19 }
  0x19   : > { %330 = vmatpush.msra.mxu1 %v321_v5  ;;  %v312_v16 = vld [vmem:[%s792_s3 + $0x20] sm:$0xff]  ;;  %v309_v19 = vld [vmem:[%s792_s3 + $0x8] sm:$0xff]  ;;  %s539_s22 = scalar_lea.hbm %s538_s19, 8  ;;  %p544_p0 = scmp.lt.s32.totalorder %s538_s19, %s796_s7 }
  0x1a   : > { %302 = vmatpush.msra.mxu0 %v275_v6  ;;  %v308_v20 = vld [vmem:[%s792_s3] sm:$0xff]  ;;  %v520_v31 = vpop.eup %519  ;;  %p540_p11 = scmp.ne.s32.totalorder %s538_s19, %s539_s22  ;;  %p545_p1 = scmp.lt.s32.totalorder %s543_s21, %s539_s22 }
  0x1b   : > { %470 = vmatmul.msk.f32.vlgmr.msra.gmra.mxu0 %vm283_vm0, %v274_v8  ;;  %331 = vmatpush.msra.mxu1 %v320_v7  ;;  %v515_v21 = vld [vmem:[%s791_s2] ss:$0 sm:$0xff]  ;;  %v353_v32 = vmul.f32 32.0, %v520_v31  ;;  %vm357_vm1 = vweird.f32 %v520_v31 }
  0x1c   : > { %v516_v25 = vld [vmem:[%s793_s4] ss:$0 sm:$0xff]  ;;  %p541_p12 = pnand %p540_p11, %p666_p5  ;;  %p546_p2 = por %p545_p1, %p544_p0 }
  0x1d   : > { %332 = vmatpush.msra.mxu1 %v319_v9  ;;  %v354_v33 = vsub.f32 1.0, %v353_v32  ;;  %v517_v51 = vld [vmem:[%s794_s5] ss:$0 sm:$0xff] }
  0x1e   : > { %v518_v54 = vld [vmem:[%s795_s6] ss:$0 sm:$0xff]  ;;  %p542_p13 = pneg %p541_p12 }
  0x1f   : > { %333 = vmatpush.msra.mxu1 %v318_v10  ;;  %v355_v34 = vmul.f32 %v520_v31, %v354_v33 }
  0x20   : > { %p547_p3 = pnand %p546_p2, %p542_p13 }
  0x21   : > { %334 = vmatpush.msra.mxu1 %v317_v11  ;;  %v356_v35 = vadd.f32 %v520_v31, %v355_v34 }
  0x23   : > { %335 = vmatpush.msra.mxu1 %v316_v12  ;;  %v358_v36 = vsel %vm357_vm1, %v520_v31, %v356_v35 }
  0x25   : > { %336 = vmatpush.msra.mxu1 %v315_v13 }
  0x27   : > { %337 = vmatpush.msra.mxu1 %v314_v14 }
  0x29   : > { %338 = vmatpush.msra.mxu1 %v313_v15 }
  0x2b   : > { %339 = vmatpush.msra.mxu1 %v312_v16 }
  0x2d   : > { %340 = vmatpush.msra.mxu1 %v311_v17 }
  0x2f   : > { %341 = vmatpush.msra.mxu1 %v310_v18 }
  0x31   : > { %342 = vmatpush.msra.mxu1 %v309_v19 }
  0x33   : > { %343 = vmatpush.msra.mxu1 %v308_v20 }
  0x98   : > { %v304_v22 = vpop.f32.mrf.mxu0 }
  0x99   : > { %v305_v23 = vadd.f32 %v515_v21, %v304_v22 }
  0x9b   : > { %v307_v24 = vmax.f32 %v305_v23, 0.0 }
  0x9d   : > { %344 = vmatmul.f32.vlgmr.msra.gmra.mxu1 %v307_v24 }
 0x11a   : > { %v345_v26 = vpop.f32.mrf.mxu1 }
 0x11b   : > { %v346_v27 = vadd.f32 %v516_v25, %v345_v26 }
 0x11d   : > { %v348_v28 = vadd.f32 %v346_v27, %v274_v8 }
 0x11f   : > { %v349_v29 = vsel %vm283_vm0, %v348_v28, 0.0 }
 0x120   : > { %350 = vadd.xlane.f32.xlu0 %v349_v29 }
 0x193   : > { %v351_v37 = vpop.xlane.xlu0 %350 }
 0x194   : > { %v359_v38 = vmul.f32 %v358_v36, %v351_v37 }
 0x196   : > { %v360_v39 = vsub.f32 %v348_v28, %v359_v38 }
 0x198   : > { %v361_v40 = vmul.f32 %v360_v39, %v360_v39 }
 0x19a   : > { %v362_v41 = vsel %vm283_vm0, %v361_v40, 0.0 }
 0x19b   : > { %363 = vadd.xlane.f32.xlu0 %v362_v41 }
 0x20e   : > { %v364_v42 = vpop.xlane.xlu0 %363 }
 0x20f   : > { %v365_v43 = vmul.f32 %v364_v42, %v358_v36 }
 0x211   : > { %v366_v44 = vadd.f32 1e-05, %v365_v43 }
 0x213   : > { %521 = vrsqrt.f32 %v366_v44  ;;  %vm373_vm3 = vweird.f32 %v366_v44 }
 0x219   : > { %v522_v45 = vpop.eup %521 }
 0x21a   : > { %v368_v46 = vmul.f32 %v522_v45, %v366_v44  ;;  %vm374_vm2 = vweird.f32 %v522_v45 }
 0x21b   : > { %vm375_vm4 = vmor %vm373_vm3, %vm374_vm2 }
 0x21c   : > { %v369_v47 = vmul.f32 %v522_v45, %v368_v46 }
 0x21e   : > { %v370_v48 = vmul.f32 0.5, %v369_v47 }
 0x220   : > { %v371_v49 = vsub.f32 1.5, %v370_v48 }
 0x222   : > { %v372_v50 = vmul.f32 %v522_v45, %v371_v49 }
 0x224   : > { %v376_v52 = vsel %vm375_vm4, %v522_v45, %v372_v50 }
 0x225   : > { %v377_v53 = vmul.f32 %v376_v52, %v360_v39 }
 0x227   : > { %v382_v55 = vmul.f32 %v517_v51, %v377_v53 }
 0x229   : > { %v387_v56 = vadd.f32 %v518_v54, %v382_v55 }
 0x22b   : > { %388 = vst.msk [vmem:[%s269_s16] sm:$0xff] %vm283_vm0, %v387_v56 }
 0x22c   : > { %550 = shalt.err (!%p547_p3)
}
 0x22d   : > { %475 = dma.vmem_to_hbm [thread:$0]  (%p666_p5), %s403_s28, 128, %s405_s17, %s390_s18  }
 0x22e PF: > { %p481_p4 = scmp.ge.s32.totalorder %s585_s27, 2  ;;  %s416_s20 = sand.u32 1, %s573_s24  }
 0x22f   : > { %s417_s13 = scalar_lea.sflag [#allocation3], %s416_s20 }
 0x230   : > { %p478_p7 = pnand %p481_p4, %p670_p6 }
 0x232   : > { %p479_p8 = pneg %p478_p7 }
 0x234   : > { %568 = dma.done.wait (%p479_p8), %s417_s13, 128  }
 0x235   : > { %570 = vsyncadd (%p479_p8), %s417_s13, 4294967168  ;;  %p17_p9 = scmp.ge.s32.totalorder %s653_s30, 4   ;;  %s799_s24 = smov %s577_s25 }
 0x236   : > { %s800_s25 = smov %s581_s26  ;;  %s801_s26 = smov %s664_s10 }
 0x237   : > { %s802_s27 = smov %s653_s30  ;;  %19 = sbr.rel (!%p17_p9) target bundleno = 3 (0x3), region = 83 }
 0x23c   :  { %423 = vsyncpa [#allocation3], 1 }
 0x23d   :  { %425 = vsyncpa [#allocation3 + $0x1], 1 }

// kernel: decoder_block.4
= control target key start
LH: loop header
LB: loop body
LE: loop exit
PB: predicated region body
PF: predicated region fallthrough
CT: control target
= control target key end

     0   :  { %s2212_s0 = inlined_call_operand.vmem [shape: f32[2,8,32], index: 0, kind: input, shape index: {}]   ;;  %s2213_s1 = inlined_call_operand.hbm [shape: f32[2,8,32], index: 1, kind: input, shape index: {}]   ;;  %s2214_s2 = inlined_call_operand.hbm [shape: f32[2,8,32], index: 2, kind: input, shape index: {}]   ;;  %s2215_s3 = inlined_call_operand.vmem [shape: f32[8,8], index: 3, kind: input, shape index: {}]   ;;  %s2216_s4 = inlined_call_operand.hbm [shape: f32[32,32], index: 4, kind: input, shape index: {}]   ;;  %s2217_s5 = inlined_call_operand.hbm [shape: f32[1,32], index: 5, kind: input, shape index: {}]   ;;  %s2218_s6 = inlined_call_operand.hbm [shape: f32[32,32], index: 6, kind: input, shape index: {}]   ;;  %s2219_s7 = inlined_call_operand.hbm [shape: f32[1,32], index: 7, kind: input, shape index: {}]   ;;  %s2220_s8 = inlined_call_operand.hbm [shape: f32[32,32], index: 8, kind: input, shape index: {}]   ;;  %s2221_s9 = inlined_call_operand.hbm [shape: f32[1,32], index: 9, kind: input, shape index: {}]   ;;  %s2222_s10 = inlined_call_operand.hbm [shape: f32[32,32], index: 10, kind: input, shape index: {}]   ;;  %s2223_s11 = inlined_call_operand.hbm [shape: f32[1,32], index: 11, kind: input, shape index: {}]   ;;  %s2224_s12 = inlined_call_operand.vmem [shape: f32[1,32], index: 12, kind: input, shape index: {}]   ;;  %s2225_s13 = inlined_call_operand.vmem [shape: f32[1,32], index: 13, kind: input, shape index: {}]   ;;  %s2226_s14 = inlined_call_operand.vmem [shape: f32[2,8,32], index: 14, kind: output, shape index: {}]  }
   0x1   :  { %2227 = sst [smem:[#allocation25_spill]] %s2215_s3 }
   0x2   :  { %2228 = sst [smem:[#allocation26_spill]] %s2216_s4 }
   0x3   :  { %2229 = sst [smem:[#allocation27_spill]] %s2217_s5 }
   0x4   :  { %2230 = sst [smem:[#allocation28_spill]] %s2218_s6 }
   0x5   :  { %2231 = sst [smem:[#allocation29_spill]] %s2219_s7 }
   0x6   :  { %2232 = sst [smem:[#allocation30_spill]] %s2220_s8 }
   0x7   :  { %2233 = sst [smem:[#allocation31_spill]] %s2224_s12 }
   0x8   :  { %2234 = sst [smem:[#allocation32_spill]] %s2225_s13 }
   0x9   :  { %2235 = sst [smem:[#allocation33_spill]] %s2226_s14 }
   0xa   :  { %19 = vsyncpa [#allocation3], 0 }
   0xb   :  { %21 = vsyncpa [#allocation3 + $0x1], 0 }
   0xc   :  { %22 = vsyncpa [#allocation5], 0 }
   0xd   :  { %24 = vsyncpa [#allocation5 + $0x1], 0 }
   0xe   :  { %25 = vsyncpa [#allocation8], 0 }
   0xf   :  { %26 = vsyncpa [#allocation11], 0 }
  0x10   :  { %27 = vsyncpa [#allocation14], 0 }
  0x11   :  { %28 = vsyncpa [#allocation17], 0  ;;  %s1944_s29 = smov 0   ;;  %s1946_s30 = smov 0  }
  0x12   :  { %s1948_s15 = smov 0   ;;  %s1950_s16 = smov 0  }
  0x13 LB: > { %s2236_s4 = sld [smem:[#allocation26_spill]]  ;;  %s1968_s20 = sadd.s32 4294967295, %s1850_s16   ;;  %s1850_s16 = sphi %s1950_s16, %s2252_s16   ;;  %s1846_s15 = sphi %s1948_s15, %s2251_s15   ;;  %s1842_s30 = sphi %s1946_s30, %s2250_s30   ;;  %s1838_s29 = sphi %s1944_s29, %s2249_s29  }
  0x14   : > { %p1287_p0 = scmp.ge.s32.totalorder %s1850_s16, 1  ;;  %p81_p1 = scmp.eq.s32.totalorder %s1968_s20, 0 }
  0x15   : > { %p374_p2 = scmp.lt.s32.totalorder %s1850_s16, 3  ;;  %s1852_s22 = smov [#allocation6]  }
  0x16   : > { %s390_s23 = sshll.u32 %s1852_s22, 4  ;;  %s2238_s5 = sld [smem:[#allocation27_spill]]  ;;  %s391_s23 = int_to_ptr.vmem [resolvable:$true] %s390_s23 }
  0x17   : > { %p1973_p3 = pnand %p1287_p0, %p374_p2  ;;  %s2240_s7 = sld [smem:[#allocation29_spill]] }
  0x18   : > { %s1853_s22 = smov [#allocation7]   ;;  %s1854_s14 = smov 128  }
  0x19   : > { %s388_s19 = sshll.u32 %s2236_s4, 4  ;;  %p1368_p4 = pneg %p1973_p3  ;;  %s389_s19 = int_to_ptr.hbm [resolvable:$true] %s388_s19 }
  0x1a   : > { %s405_s4 = sshll.u32 %s1853_s22, 4  ;;  %s1855_s13 = smov 8   ;;  %s406_s4 = int_to_ptr.vmem [resolvable:$true] %s405_s4 }
  0x1b   : > { %p1984_p5 = pnand %p1368_p4, %p81_p1  ;;  %s1856_s28 = smov [#allocation10]  }
  0x1c   : > { %s403_s26 = sshll.u32 %s2238_s5, 4  ;;  %s455_s5 = sshll.u32 %s2221_s9, 4  ;;  %s404_s26 = int_to_ptr.hbm [resolvable:$true] %s403_s26  ;;  %s456_s5 = int_to_ptr.hbm [resolvable:$true] %s455_s5 }
  0x1d   : > { %s429_s18 = sshll.u32 %s2240_s7, 4  ;;  %s431_s17 = sshll.u32 %s1856_s28, 4  ;;  %s430_s18 = int_to_ptr.hbm [resolvable:$true] %s429_s18  ;;  %s432_s17 = int_to_ptr.vmem [resolvable:$true] %s431_s17 }
  0x1e   : > { %1371 = dma.hbm_to_vmem [thread:$0]  (!%p1984_p5), %s389_s19, 512, %s391_s23, [#allocation5], %s1854_s14, %s1854_s14, %s1855_s13  }
  0x1f   : > { %1374 = dma.hbm_to_vmem [thread:$0]  (!%p1984_p5), %s404_s26, 16, %s406_s4, [#allocation8]  }
  0x20   : > { %1380 = dma.hbm_to_vmem [thread:$0]  (!%p1984_p5), %s430_s18, 16, %s432_s17, [#allocation11]  }
  0x21   : > { %s1857_s22 = smov [#allocation13]   ;;  %s2241_s6 = sld [smem:[#allocation28_spill]] }
  0x22   : > { %s457_s7 = sshll.u32 %s1857_s22, 4  ;;  %s2242_s8 = sld [smem:[#allocation30_spill]]  ;;  %s458_s7 = int_to_ptr.vmem [resolvable:$true] %s457_s7 }
  0x23   : > { %1386 = dma.hbm_to_vmem [thread:$0]  (!%p1984_p5), %s456_s5, 16, %s458_s7, [#allocation14]  }
  0x24   : > { %s1858_s24 = smov [#allocation9]   ;;  %s1859_s3 = smov [#allocation12]  }
  0x25   : > { %s416_s25 = sshll.u32 %s1858_s24, 4  ;;  %s442_s12 = sshll.u32 %s1859_s3, 4  ;;  %s417_s25 = int_to_ptr.vmem [resolvable:$true] %s416_s25  ;;  %s443_s12 = int_to_ptr.vmem [resolvable:$true] %s442_s12 }
  0x26   : > { %s466_s7 = sshll.u32 %s2222_s10, 4  ;;  %s481_s22 = sshll.u32 %s2223_s11, 4  ;;  %s467_s7 = int_to_ptr.hbm [resolvable:$true] %s466_s7  ;;  %s482_s22 = int_to_ptr.hbm [resolvable:$true] %s481_s22 }
  0x27   : > { %s414_s19 = sshll.u32 %s2241_s6, 4  ;;  %s1861_s23 = smov [#allocation16]   ;;  %s415_s19 = int_to_ptr.hbm [resolvable:$true] %s414_s19 }
  0x28   : > { %s440_s26 = sshll.u32 %s2242_s8, 4  ;;  %s2035_s24 = sadd.s32 1, %s1850_s16   ;;  %s441_s26 = int_to_ptr.hbm [resolvable:$true] %s440_s26 }
  0x29   : > { %1377 = dma.hbm_to_vmem [thread:$0]  (!%p1984_p5), %s415_s19, 512, %s417_s25, [#allocation8], %s1854_s14, %s1854_s14, %s1855_s13  }
  0x2a   : > { %1383 = dma.hbm_to_vmem [thread:$0]  (!%p1984_p5), %s441_s26, 512, %s443_s12, [#allocation11], %s1854_s14, %s1854_s14, %s1855_s13  }
  0x2b   : > { %s1860_s19 = smov [#allocation15]   ;;  %s483_s26 = sshll.u32 %s1861_s23, 4  ;;  %s484_s26 = int_to_ptr.vmem [resolvable:$true] %s483_s26 }
  0x2c   : > { %s468_s4 = sshll.u32 %s1860_s19, 4  ;;  %s67_s25 = sadd.s32 1, %s1846_s15  ;;  %s469_s4 = int_to_ptr.vmem [resolvable:$true] %s468_s4 }
  0x2d   : > { %1389 = dma.hbm_to_vmem [thread:$0]  (!%p1984_p5), %s467_s7, 512, %s469_s4, [#allocation14], %s1854_s14, %s1854_s14, %s1855_s13  }
  0x2e   : > { %1392 = dma.hbm_to_vmem [thread:$0]  (!%p1984_p5), %s482_s22, 16, %s484_s26, [#allocation17]  }
  0x2f   : > { %s64_s3 = ssub.s32 %s1850_s16, %s2035_s24  ;;  %p74_p6 = scmp.ne.s32.totalorder %s1846_s15, %s1842_s30 }
  0x30   : > { %p65_p7 = scmp.eq.s32.totalorder %s64_s3, 0  ;;  %p75_p8 = scmp.eq.s32.totalorder %s1850_s16, 0 }
  0x31   : > { %p80_p9 = scmp.ne.s32.totalorder %s1842_s30, %s1838_s29  ;;  %p1408_p10 = scmp.lt.s32.totalorder %s1850_s16, 2 }
  0x32   : > { %s2047_s13 = scalar_select %p65_p7, %s1846_s15, %s67_s25  }
  0x33   : > { %p76_p11 = por %p75_p8, %p74_p6  ;;  %p2051_p12 = por %p81_p1, %p80_p9 }
  0x34   : > { %s507_s27 = sand.u32 1, %s1846_s15   ;;  %s1298_s12 = sshll.u32 %s1850_s16, 3 }
  0x35   : > { %s1297_s18 = sshll.u32 %s507_s27, 3  ;;  %s515_s28 = scalar_lea.hbm %s2213_s1, %s1298_s12 }
  0x36   : > { %s517_s17 = sshll.u32 %s515_s28, 4  ;;  %s511_s22 = scalar_lea.vmem [#allocation2], %s1297_s18  ;;  %s518_s17 = int_to_ptr.hbm [resolvable:$true] %s517_s17 }
  0x37   : > { %s519_s29 = sshll.u32 %s511_s22, 4  ;;  %p2062_p13 = pnand %p1408_p10, %p76_p11  ;;  %s520_s29 = int_to_ptr.vmem [resolvable:$true] %s519_s29 }
  0x38   : > { %s534_s26 = scalar_lea.hbm %s2214_s2, %s1298_s12  ;;  %s526_s25 = sand.u32 1, %s1850_s16  }
  0x39   : > { %s508_s3 = scalar_lea.sflag [#allocation3], %s507_s27  ;;  %s1732_s5 = sshra.s32 %s518_s17, 4  ;;  %s1733_s5 = int_to_ptr.hbm [resolvable:$true] %s1732_s5 }
  0x3a   : > { %s1734_s7 = scalar_lea.hbm %s1733_s5, 8  ;;  %p1736_p2 = pneg %p2062_p13 }
  0x3b   : > { %p1735_p0 = scmp.ne.s32.totalorder %s1733_s5, %s1734_s7  ;;  %s1739_s6 = scalar_lea.hbm %s2213_s1, 16 }
  0x3c   : > { %p1740_p6 = scmp.lt.s32.totalorder %s1733_s5, %s2213_s1  ;;  %p1741_p7 = scmp.lt.s32.totalorder %s1739_s6, %s1734_s7 }
  0x3d   : > { %p1737_p4 = pnand %p1736_p2, %p1735_p0 }
  0x3e   : > { %p1742_p8 = por %p1741_p7, %p1740_p6 }
  0x3f   : > { %p1738_p5 = pneg %p1737_p4 }
  0x41   : > { %p1743_p9 = pnand %p1742_p8, %p1738_p5 }
  0x43   : > { %1746 = shalt.err (!%p1743_p9)
}
  0x44   : > { %1396 = dma.hbm_to_vmem [thread:$0]  (!%p2062_p13), %s518_s17, 128, %s520_s29, %s508_s3  }
  0x45   : > { %s536_s16 = sshll.u32 %s534_s26, 4  ;;  %s530_s27 = scalar_lea.vmem [#allocation4], %s1297_s18  ;;  %s537_s16 = int_to_ptr.hbm [resolvable:$true] %s536_s16 }
  0x46   : > { %s538_s12 = sshll.u32 %s530_s27, 4  ;;  %s527_s8 = scalar_lea.sflag [#allocation5], %s526_s25  ;;  %s539_s12 = int_to_ptr.vmem [resolvable:$true] %s538_s12 }
  0x47   : > { %s1762_s28 = sshra.s32 %s537_s16, 4  ;;  %s1769_s7 = scalar_lea.hbm %s2214_s2, 16  ;;  %s1763_s28 = int_to_ptr.hbm [resolvable:$true] %s1762_s28 }
  0x48   : > { %s1764_s22 = scalar_lea.hbm %s1763_s28, 8  ;;  %p1770_p4 = scmp.lt.s32.totalorder %s1763_s28, %s2214_s2 }
  0x49   : > { %p1765_p10 = scmp.ne.s32.totalorder %s1763_s28, %s1764_s22  ;;  %p1771_p5 = scmp.lt.s32.totalorder %s1769_s7, %s1764_s22 }
  0x4b   : > { %p1767_p11 = pnand %p1765_p10, %p1736_p2  ;;  %p1772_p6 = por %p1771_p5, %p1770_p4 }
  0x4d   : > { %p1768_p0 = pneg %p1767_p11 }
  0x4f   : > { %p1773_p7 = pnand %p1772_p6, %p1768_p0 }
  0x51   : > { %1776 = shalt.err (!%p1773_p7)
}
  0x52   : > { %1399 = dma.hbm_to_vmem [thread:$0]  (!%p2062_p13), %s537_s16, 128, %s539_s12, %s527_s8  }
  0x53   : > { %547 = sbr.rel (%p1973_p3) target bundleno = 1408 (0x580), region = 76  ;;  %s549_s18 = sand.u32 (!%p1973_p3), 1, %s1842_s30  }
  0x54   : > { %s2097_s29 = sshll.u32 (!%p1973_p3), %s549_s18, 3  ;;  %s550_s26 = scalar_lea.sflag (!%p1973_p3), [#allocation3], %s549_s18 }
  0x55   : > { %s553_s25 = scalar_lea.vmem (!%p1973_p3), [#allocation2], %s2097_s29 }
  0x58   : > { %1809 = dma.done.wait (%p2051_p12), %s550_s26, 128  }
  0x59   : > { %1811 = vsyncadd (%p2051_p12), %s550_s26, 4294967168  ;;  %s559_s8 = sand.u32 1, %s1968_s20   ;;  %s563_s21 = scalar_lea.vmem [#allocation4], %s2097_s29 }
  0x5a   : > { %s560_s19 = scalar_lea.sflag [#allocation5], %s559_s8 }
  0x5b   : > { %1813 = dma.done.wait (%p2051_p12), %s560_s19, 128  }
  0x5c   : > { %1815 = vsyncadd (%p2051_p12), %s560_s19, 4294967168 }
  0x5d   : > { %1817 = dma.done.wait (%p81_p1), [#allocation5], 512  }
  0x5e   : > { %1819 = vsyncadd (%p81_p1), [#allocation5], 4294966784 }
  0x5f   : > { %1821 = dma.done.wait (%p81_p1), [#allocation8], 528  }
  0x60   : > { %1823 = vsyncadd (%p81_p1), [#allocation8], 4294966768 }
  0x61   : > { %1825 = dma.done.wait (%p81_p1), [#allocation11], 528  }
  0x62   : > { %1827 = vsyncadd (%p81_p1), [#allocation11], 4294966768 }
  0x63   : > { %1829 = dma.done.wait (%p81_p1), [#allocation14], 528  }
  0x64   : > { %1831 = vsyncadd (%p81_p1), [#allocation14], 4294966768 }
  0x65   : > { %1833 = dma.done.wait (%p81_p1), [#allocation17], 16  }
  0x66   : > { %1835 = vsyncadd (%p81_p1), [#allocation17], 4294967280  ;;  %p657_p3 = scmp.lt.s32.totalorder %s1968_s20, 1  ;;  %v703_v0 = vld [vmem:[#allocation9 + $0x18] sm:$0xff]  ;;  %v702_v2 = vld [vmem:[#allocation9 + $0x10] sm:$0xff]  ;;  %vm676_vm0 = vcmask 261120  }
  0x67   : > { %v671_v1 = vld [vmem:[#allocation6 + $0x18] sm:$0xff]  ;;  %723 = vmatpush.msra.mxu1 %v703_v0  ;;  %v670_v3 = vld [vmem:[#allocation6 + $0x10] sm:$0xff]  ;;  %v669_v5 = vld [vmem:[#allocation6 + $0x8] sm:$0xff]  ;;  %vm764_vm1 = vcmask 64512   ;;  %s1862_s27 = smov 104   ;;  %s1863_s12 = smov 120  }
  0x68   : > { %s2254_s20 = smov (!%p657_p3, %s1968_s20), 1  ;;  %692 = vmatpush.msra.mxu0 %v671_v1  ;;  %v701_v4 = vld [vmem:[#allocation9 + $0x8] sm:$0xff]  ;;  %v700_v6 = vld [vmem:[#allocation9] sm:$0xff]  ;;  %v1467_v11 = vld [vmem:[#allocation7] ss:$0 sm:$0xff]  ;;  %s1864_s28 = smov 112  }
  0x69   : > { %s1312_s14 = sshll.u32 %s2254_s20, 3  ;;  %724 = vmatpush.msra.mxu1 %v702_v2  ;;  %v668_v7 = vld [vmem:[#allocation6] sm:$0xff]  ;;  %v733_v18 = vld [vmem:[#allocation12 + $0x10] sm:$0xff]  ;;  %v732_v19 = vld [vmem:[#allocation12 + $0x8] sm:$0xff]  ;;  %s2245_s5 = sld [smem:[#allocation25_spill]]  ;;  %vm1034_vm2 = vcmask 130048  }
  0x6a   : > { %s660_s16 = scalar_lea.vmem %s2212_s0, %s1312_s14  ;;  %693 = vmatpush.msra.mxu0 %v670_v3  ;;  %v666_v8 = vld [vmem:[%s553_s25] sm:$0xff]  ;;  %v667_v21 = vld [vmem:[%s563_s21] sm:$0xff]  ;;  %s1865_s7 = smov 16   ;;  %vm1036_vm3 = vcmask 195584  }
  0x6b   : > { %725 = vmatpush.msra.mxu1 %v701_v4  ;;  %v2142_v9 = vld [vmem:[%s660_s16] sm:$0xff]  ;;  %s1866_s4 = smov 8   ;;  %s1867_s17 = smov 24  }
  0x6c   : > { %694 = vmatpush.msra.mxu0 %v669_v5  ;;  %v1466_v10 = vld [vmem:[#allocation10] ss:$0 sm:$0xff]  ;;  %v731_v20 = vld [vmem:[#allocation12] sm:$0xff]  ;;  %s2246_s26 = sld [smem:[#allocation31_spill]] }
  0x6d   : > { %726 = vmatpush.msra.mxu1 %v700_v6  ;;  %v734_v17 = vld [vmem:[#allocation12 + $0x18] sm:$0xff]  ;;  %v1468_v32 = vld [vmem:[#allocation13] ss:$0 sm:$0xff]  ;;  %s2247_s19 = sld [smem:[#allocation32_spill]] }
  0x6e   : > { %695 = vmatpush.msra.mxu0 %v668_v7  ;;  %1315 = vmatmul.msk.f32.vlgmr.msra.gmra.mxu1 %vm676_vm0, %v666_v8  ;;  %s2248_s23 = sld [smem:[#allocation33_spill]] }
  0x6f   : > { %1314 = vmatmul.msk.f32.vlgmr.msra.gmra.mxu0 %vm676_vm0, %v2142_v9  ;;  %754 = vmatpush.msra.mxu2 %v734_v17  ;;  %v763_v28 = vld [vmem:[%s2245_s5] sm:$0xff] }
  0x71   : > { %755 = vmatpush.msra.mxu2 %v733_v18 }
  0x73   : > { %756 = vmatpush.msra.mxu2 %v732_v19 }
  0x74   : > { %s664_s16 = scalar_lea.vmem %s2248_s23, %s1312_s14 }
  0x75   : > { %757 = vmatpush.msra.mxu2 %v731_v20  ;;  %v1041_v20 = vld [vmem:[#allocation15 + $0x18] sm:$0xff] }
  0x76   : > { %1316 = vmatmul.msk.f32.vlgmr.msra.gmra.mxu2 %vm676_vm0, %v667_v21  ;;  %v1040_v21 = vld [vmem:[#allocation15 + $0x10] sm:$0xff] }
  0xeb   : > { %v728_v12 = vpop.f32.mrf.mxu1 }
  0xec   : > { %v697_v13 = vpop.f32.mrf.mxu0  ;;  %v729_v14 = vadd.f32 %v1466_v10, %v728_v12 }
  0xed   : > { %v698_v15 = vadd.f32 %v1467_v11, %v697_v13 }
  0xee   : > { %958 = vrot.lane.b32.xlu2 %v729_v14, %s1862_s27  ;;  %827 = vrot.lane.b32.xlu1 %v729_v14, %s1863_s12 }
  0xef   : > { %v762_v16 = vmul.f32 0.17677669, %v698_v15  ;;  %893 = vrot.lane.b32.xlu0 %v729_v14, %s1864_s28  ;;  %1317 = vmatpush.xpose.msk.msra.mxu3 %vm764_vm1, %v729_v14 }
  0xf2   : > { %1318 = vmatmul.msk.f32.vlgmr.msra.gmra.mxu3 %vm764_vm1, %v762_v16 }
  0xf6   : > { %956 = vrot.lane.b32.xlu2 %v762_v16, %s1862_s27  ;;  %825 = vrot.lane.b32.xlu1 %v762_v16, %s1863_s12 }
  0xf7   : > { %891 = vrot.lane.b32.xlu0 %v762_v16, %s1864_s28 }
  0xf9   : > { %v759_v33 = vpop.f32.mrf.mxu2 }
  0xfa   : > { %v760_v34 = vadd.f32 %v1468_v32, %v759_v33 }
  0xfc   : > { %820 = vmatpush.msrb.mxu3 %v760_v34 }
 0x148   : > { %v959_v23 = vpop.permute.xlu2 %958 }
 0x150   : > { %v957_v27 = vpop.permute.xlu2 %956 }
 0x160   : > { %v828_v22 = vpop.permute.xlu1 %827 }
 0x161   : > { %v894_v24 = vpop.permute.xlu0 %893  ;;  %1320 = vmatpush.xpose.msk.msrb.mxu0 %vm764_vm1, %v828_v22  ;;  %v1039_v22 = vld [vmem:[#allocation15 + $0x8] sm:$0xff] }
 0x162   : > { %1323 = vmatpush.xpose.msk.msrb.mxu2 %vm764_vm1, %v894_v24 }
 0x165   : > { %1326 = vmatpush.xpose.msk.msra.mxu0 %vm764_vm1, %v959_v23  ;;  %v1038_v23 = vld [vmem:[#allocation15] sm:$0xff] }
 0x166   : > { %1061 = vmatpush.msra.mxu2 %v1041_v20 }
 0x168   : > { %v826_v25 = vpop.permute.xlu1 %825  ;;  %1062 = vmatpush.msra.mxu2 %v1040_v21 }
 0x169   : > { %v892_v26 = vpop.permute.xlu0 %891  ;;  %1321 = vmatmul.msk.f32.vlgmr.msrb.gmra.mxu0 %vm764_vm1, %v826_v25 }
 0x16a   : > { %1324 = vmatmul.msk.f32.vlgmr.msrb.gmra.mxu2 %vm764_vm1, %v892_v26 }
 0x16b   : > { %1063 = vmatpush.msra.mxu2 %v1039_v22 }
 0x16d   : > { %1064 = vmatpush.msra.mxu2 %v1038_v23 }
 0x171   : > { %1327 = vmatmul.msk.f32.vlgmr.msra.gmra.mxu0 %vm764_vm1, %v957_v27 }
 0x175   : > { %v788_v29 = vpop.f32.mrf.mxu3 }
 0x176   : > { %v789_v30 = vadd.f32 %v788_v29, %v763_v28 }
 0x178   : > { %v791_v31 = vsel %vm764_vm1, %v789_v30, -inf }
 0x179   : > { %792 = vmax.xlane.f32.xlu0 %v791_v31 }
 0x1e6   : > { %v850_v35 = vpop.f32.mrf.mxu0 }
 0x1e7   : > { %v851_v36 = vadd.f32 %v850_v35, %v763_v28  ;;  %v1868_v35 = vmov 32.0  }
 0x1e9   : > { %v853_v37 = vsel %vm764_vm1, %v851_v36, -inf }
 0x1ea   : > { %854 = vmax.xlane.f32.xlu1 %v853_v37 }
 0x1ec   : > { %v793_v38 = vpop.xlane.xlu0 %792 }
 0x1ed   : > { %v794_v39 = vsub.f32 %v789_v30, %v793_v38  ;;  %v916_v40 = vpop.f32.mrf.mxu2  ;;  %v1469_v30 = vld [vmem:[#allocation16] ss:$0 sm:$0xff] }
 0x1ee   : > { %v917_v41 = vadd.f32 %v916_v40, %v763_v28  ;;  %v981_v44 = vpop.f32.mrf.mxu0 }
 0x1ef   : > { %v795_v42 = vmul.f32 1.442695, %v794_v39  ;;  %v982_v45 = vadd.f32 %v981_v44, %v763_v28 }
 0x1f0   : > { %v919_v43 = vsel %vm764_vm1, %v917_v41, -inf }
 0x1f1   : > { %1472 = vpow2.f32 %v795_v42  ;;  %920 = vmax.xlane.f32.xlu2 %v919_v43  ;;  %v984_v47 = vsel %vm764_vm1, %v982_v45, -inf }
 0x1f7   : > { %v1473_v46 = vpop.eup %1472 }
 0x1f8   : > { %v797_v48 = vsel %vm764_vm1, %v1473_v46, 0.0 }
 0x1f9   : > { %985 = vmax.xlane.f32.xlu2 %v984_v47  ;;  %798 = vadd.xlane.f32.xlu0 %v797_v48 }
 0x25d   : > { %v855_v49 = vpop.xlane.xlu1 %854 }
 0x25e   : > { %v856_v50 = vsub.f32 %v851_v36, %v855_v49 }
 0x260   : > { %v857_v51 = vmul.f32 1.442695, %v856_v50 }
 0x262   : > { %1474 = vpow2.f32 %v857_v51 }
 0x264   : > { %v921_v52 = vpop.xlane.xlu2 %920 }
 0x265   : > { %v922_v53 = vsub.f32 %v917_v41, %v921_v52 }
 0x267   : > { %v923_v54 = vmul.f32 1.442695, %v922_v53 }
 0x268   : > { %v1475_v55 = vpop.eup %1474 }
 0x269   : > { %1476 = vpow2.f32 %v923_v54  ;;  %v859_v56 = vsel %vm764_vm1, %v1475_v55, 0.0 }
 0x26a   : > { %860 = vadd.xlane.f32.xlu1 %v859_v56 }
 0x26c   : > { %v986_v57 = vpop.xlane.xlu2 %985  ;;  %v799_v58 = vpop.xlane.xlu0 %798 }
 0x26d   : > { %v987_v59 = vsub.f32 %v982_v45, %v986_v57  ;;  %1478 = vrcp.f32 %v799_v58  ;;  %v1471_v57 = vld [vmem:[%s2247_s19] ss:$0 sm:$0xff] }
 0x26f   : > { %v1477_v60 = vpop.eup %1476  ;;  %v988_v61 = vmul.f32 1.442695, %v987_v59 }
 0x270   : > { %v925_v62 = vsel %vm764_vm1, %v1477_v60, 0.0 }
 0x271   : > { %1480 = vpow2.f32 %v988_v61  ;;  %926 = vadd.xlane.f32.xlu2 %v925_v62 }
 0x273   : > { %v1479_v63 = vpop.eup %1478 }
 0x274   : > { %v801_v0 = vmul.f32 %v1479_v63, %v1473_v46 }
 0x276   : > { %1319 = vmatmul.msk.f32.vlgmr.msrb.gmra.mxu3 %vm764_vm1, %v801_v0 }
 0x277   : > { %v1481_v1 = vpop.eup %1480 }
 0x278   : > { %v990_v2 = vsel %vm764_vm1, %v1481_v1, 0.0 }
 0x279   : > { %991 = vadd.xlane.f32.xlu0 %v990_v2 }
 0x283   : > { %865 = vrot.lane.b32.xlu1 %v760_v34, %s1863_s12 }
 0x289   : > { %930 = vrot.lane.b32.xlu2 %v760_v34, %s1864_s28 }
 0x28d   : > { %995 = vrot.lane.b32.xlu0 %v760_v34, %s1862_s27 }
 0x2dd   : > { %v861_v4 = vpop.xlane.xlu1 %860 }
 0x2e4   : > { %v927_v3 = vpop.xlane.xlu2 %926 }
 0x2e5   : > { %1482 = vrcp.f32 %v927_v3 }
 0x2e6   : > { %1484 = vrcp.f32 %v861_v4 }
 0x2eb   : > { %v1483_v5 = vpop.eup %1482 }
 0x2ec   : > { %v929_v6 = vmul.f32 %v1483_v5, %v1477_v60  ;;  %v931_v7 = vpop.permute.xlu2 %930  ;;  %v1485_v8 = vpop.eup %1484 }
 0x2ed   : > { %951 = vmatpush.msra.mxu3 %v931_v7  ;;  %v992_v10 = vpop.xlane.xlu0 %991  ;;  %v863_v12 = vmul.f32 %v1485_v8, %v1475_v55  ;;  %v1470_v55 = vld [vmem:[%s2246_s26] ss:$0 sm:$0xff] }
 0x2ee   : > { %1325 = vmatmul.msk.f32.vlgmr.msra.gmra.mxu3 %vm764_vm1, %v929_v6  ;;  %1486 = vrcp.f32 %v992_v10 }
 0x2ef   : > { %1488 = vrcp.f32 %v1868_v35 }
 0x2f4   : > { %v1487_v13 = vpop.eup %1486 }
 0x2f5   : > { %v866_v11 = vpop.permute.xlu1 %865  ;;  %v994_v14 = vmul.f32 %v1487_v13, %v1481_v1  ;;  %v1489_v36 = vpop.eup %1488 }
 0x2f6   : > { %886 = vmatpush.msrb.mxu1 %v866_v11  ;;  %v1074_v37 = vmul.f32 32.0, %v1489_v36  ;;  %vm1078_vm4 = vweird.f32 %v1489_v36 }
 0x2f7   : > { %1322 = vmatmul.msk.f32.vlgmr.msrb.gmra.mxu1 %vm764_vm1, %v863_v12 }
 0x2f8   : > { %v1075_v38 = vsub.f32 1.0, %v1074_v37 }
 0x2f9   : > { %v822_v16 = vpop.f32.mrf.mxu3 }
 0x2fa   : > { %v1076_v39 = vmul.f32 %v1489_v36, %v1075_v38 }
 0x2fc   : > { %v1077_v40 = vadd.f32 %v1489_v36, %v1076_v39 }
 0x2fe   : > { %v1079_v41 = vsel %vm1078_vm4, %v1489_v36, %v1077_v40 }
 0x2ff   : > { %v996_v15 = vpop.permute.xlu0 %995 }
 0x300   : > { %1016 = vmatpush.msra.mxu1 %v996_v15 }
 0x301   : > { %1328 = vmatmul.msk.f32.vlgmr.msra.gmra.mxu1 %vm764_vm1, %v994_v14 }
 0x371   : > { %v953_v17 = vpop.f32.mrf.mxu3 }
 0x372   : > { %1026 = vrot.lane.b32.xlu0 %v953_v17, %s1865_s7 }
 0x374   : > { %v888_v18 = vpop.f32.mrf.mxu1 }
 0x375   : > { %1022 = vrot.lane.b32.xlu1 %v888_v18, %s1866_s4 }
 0x37e   : > { %v1018_v19 = vpop.f32.mrf.mxu1 }
 0x37f   : > { %1030 = vrot.lane.b32.xlu2 %v1018_v19, %s1867_s17 }
 0x3d9   : > { %v1031_v27 = vpop.permute.xlu2 %1030 }
 0x3e4   : > { %v1027_v25 = vpop.permute.xlu0 %1026 }
 0x3e7   : > { %v1023_v24 = vpop.permute.xlu1 %1022 }
 0x3e8   : > { %v1033_v26 = vsel %vm764_vm1, %v822_v16, %v1023_v24 }
 0x3e9   : > { %v1035_v28 = vsel %vm1034_vm2, %v1033_v26, %v1027_v25 }
 0x3ea   : > { %v1037_v29 = vsel %vm1036_vm3, %v1035_v28, %v1031_v27 }
 0x3eb   : > { %1329 = vmatmul.msk.f32.vlgmr.msra.gmra.mxu2 %vm676_vm0, %v1037_v29 }
 0x46e   : > { %v1066_v31 = vpop.f32.mrf.mxu2 }
 0x46f   : > { %v1067_v32 = vadd.f32 %v1469_v30, %v1066_v31 }
 0x471   : > { %v1069_v33 = vadd.f32 %v1067_v32, %v2142_v9 }
 0x473   : > { %v1070_v34 = vsel %vm676_vm0, %v1069_v33, 0.0 }
 0x474   : > { %1071 = vadd.xlane.f32.xlu1 %v1070_v34 }
 0x4e7   : > { %v1072_v42 = vpop.xlane.xlu1 %1071 }
 0x4e8   : > { %v1080_v43 = vmul.f32 %v1079_v41, %v1072_v42 }
 0x4ea   : > { %v1081_v44 = vsub.f32 %v1069_v33, %v1080_v43 }
 0x4ec   : > { %v1082_v45 = vmul.f32 %v1081_v44, %v1081_v44 }
 0x4ee   : > { %v1083_v46 = vsel %vm676_vm0, %v1082_v45, 0.0 }
 0x4ef   : > { %1084 = vadd.xlane.f32.xlu0 %v1083_v46 }
 0x562   : > { %v1085_v9 = vpop.xlane.xlu0 %1084 }
 0x563   : > { %v1086_v47 = vmul.f32 %v1085_v9, %v1079_v41 }
 0x565   : > { %v1087_v48 = vadd.f32 1e-05, %v1086_v47 }
 0x567   : > { %1490 = vrsqrt.f32 %v1087_v48  ;;  %vm1094_vm6 = vweird.f32 %v1087_v48 }
 0x56d   : > { %v1491_v49 = vpop.eup %1490 }
 0x56e   : > { %v1089_v50 = vmul.f32 %v1491_v49, %v1087_v48  ;;  %vm1095_vm5 = vweird.f32 %v1491_v49 }
 0x56f   : > { %vm1096_vm7 = vmor %vm1094_vm6, %vm1095_vm5 }
 0x570   : > { %v1090_v51 = vmul.f32 %v1491_v49, %v1089_v50 }
 0x572   : > { %v1091_v52 = vmul.f32 0.5, %v1090_v51 }
 0x574   : > { %v1092_v53 = vsub.f32 1.5, %v1091_v52 }
 0x576   : > { %v1093_v54 = vmul.f32 %v1491_v49, %v1092_v53 }
 0x578   : > { %v1097_v56 = vsel %vm1096_vm7, %v1491_v49, %v1093_v54 }
 0x579   : > { %v1098_v58 = vmul.f32 %v1097_v56, %v1081_v44 }
 0x57b   : > { %v1103_v59 = vmul.f32 %v1470_v55, %v1098_v58 }
 0x57d   : > { %v1108_v60 = vadd.f32 %v1471_v57, %v1103_v59 }
 0x57f   : > { %1109 = vst.msk [vmem:[%s664_s16] sm:$0xff] %vm676_vm0, %v1108_v60 }
 0x580 PF: > { %p31_p1 = scmp.ge.s32.totalorder %s2035_s24, 4   ;;  %s2249_s29 = smov %s1842_s30 }
 0x581   : > { %s2250_s30 = smov %s1846_s15  ;;  %s2251_s15 = smov %s2047_s13 }
 0x582   : > { %s2252_s16 = smov %s2035_s24  ;;  %33 = sbr.rel (!%p31_p1) target bundleno = 19 (0x13), region = 164 }
 0x587   :  { %1129 = vsyncpa [#allocation3], 1 }
 0x588   :  { %1131 = vsyncpa [#allocation3 + $0x1], 1 }
 0x589   :  { %1132 = vsyncpa [#allocation5], 1 }
 0x58a   :  { %1134 = vsyncpa [#allocation5 + $0x1], 1 }
 0x58b   :  { %1135 = vsyncpa [#allocation8], 1 }
 0x58c   :  { %1136 = vsyncpa [#allocation11], 1 }
 0x58d   :  { %1137 = vsyncpa [#allocation14], 1 }
 0x58e   :  { %1138 = vsyncpa [#allocation17], 1 }

</bundles_post_ra>
